<compile_context>
chip_gen: v5e
topology: v5e:2x2
jax: 0.10.0
libtpu: 0.0.40
codegen_flags: <defaults>
</compile_context>

<pallas_src>
import jax
import jax.numpy as jnp
from jax.experimental import pallas as pl
from jax.experimental.pallas import tpu as pltpu

EPS = 1e-5


def bn_relu_conv1x1_kernel(x_ref, gamma_ref, beta_ref, w_ref, o_ref, y_ref):
    # x_ref:     (P, Cin)   f32, flattened N*H*W pixels x input channels (resident)
    # gamma_ref: (1, Cin)   f32 BN scale (resident)
    # beta_ref:  (1, Cin)   f32 BN shift (resident)
    # w_ref:     (Cin, tn)  bf16 slice of the 1x1 conv weight (per Cout tile)
    # o_ref:     (P, tn)    f32 output slice (per Cout tile)
    # y_ref:     (P, Cin)   bf16 VMEM scratch holding relu(bn(x)), computed once

    @pl.when(pl.program_id(0) == 0)
    def _():
        x = x_ref[...]                                   # (P, Cin) f32
        inv_p = 1.0 / x.shape[0]
        # Single fused pass over x: sum and sum-of-squares.
        mean = jnp.sum(x, axis=0, keepdims=True) * inv_p          # (1, Cin)
        ex2 = jnp.sum(x * x, axis=0, keepdims=True) * inv_p       # (1, Cin)
        var = ex2 - mean * mean                                   # biased (training) var
        scale = jax.lax.rsqrt(var + EPS) * gamma_ref[...]         # (1, Cin)
        shift = beta_ref[...] - mean * scale                      # (1, Cin)
        y = jnp.maximum(x * scale + shift, 0.0)                   # BN + ReLU
        y_ref[...] = y.astype(jnp.bfloat16)

    # 1x1 conv == matmul over channels; bf16 operands, f32 accumulation on the MXU.
    o_ref[...] = jnp.dot(
        y_ref[...], w_ref[...], preferred_element_type=jnp.float32
    ).astype(o_ref.dtype)


def bn_relu_conv1x1(x_nchw, gamma, beta, conv_w, *, tn=256):
    """x_nchw: (N, Cin, H, W) f32; conv_w: (Cout, Cin, 1, 1) f32. Returns (N, Cout, H, W) f32."""
    N, Cin, H, W = x_nchw.shape
    Cout = conv_w.shape[0]
    P = N * H * W
    assert Cout % tn == 0

    # NCHW -> (P, Cin): channels on the lane axis.
    x_pc = jnp.transpose(x_nchw, (0, 2, 3, 1)).reshape(P, Cin)
    w_ck = conv_w.reshape(Cout, Cin).T.astype(jnp.bfloat16)   # (Cin, Cout) bf16
    gamma2 = gamma.reshape(1, Cin)
    beta2 = beta.reshape(1, Cin)

    out_pc = pl.pallas_call(
        bn_relu_conv1x1_kernel,
        out_shape=jax.ShapeDtypeStruct((P, Cout), jnp.float32),
        grid_spec=pltpu.PrefetchScalarGridSpec(
            num_scalar_prefetch=0,
            grid=(Cout // tn,),
            in_specs=[
                pl.BlockSpec((P, Cin), lambda j: (0, 0)),     # x: resident
                pl.BlockSpec((1, Cin), lambda j: (0, 0)),     # gamma: resident
                pl.BlockSpec((1, Cin), lambda j: (0, 0)),     # beta: resident
                pl.BlockSpec((Cin, tn), lambda j: (0, j)),    # weight: per Cout tile
            ],
            out_specs=pl.BlockSpec((P, tn), lambda j: (0, j)),
            scratch_shapes=[pltpu.VMEM((P, Cin), jnp.bfloat16)],
        ),
        compiler_params=pltpu.CompilerParams(
            # Cout axis carries the y scratch computed at step 0 -> "arbitrary".
            dimension_semantics=("arbitrary",),
        ),
    )(x_pc, gamma2, beta2, w_ck)

    # (P, Cout) -> NCHW (N, Cout, H, W).
    return jnp.transpose(out_pc.reshape(N, H, W, Cout), (0, 3, 1, 2))


if __name__ == "__main__":
    key = jax.random.PRNGKey(0)
    k_x, k_w, k_g, k_b = jax.random.split(key, 4)

    N, Cin, H, W = 1, 256, 14, 14
    Cout = 1024

    x = jax.random.normal(k_x, (N, Cin, H, W), dtype=jnp.float32)
    conv_w = jax.random.normal(k_w, (Cout, Cin, 1, 1), dtype=jnp.float32) * 0.05
    gamma = 1.0 + 0.1 * jax.random.normal(k_g, (Cin,), dtype=jnp.float32)
    beta = 0.1 * jax.random.normal(k_b, (Cin,), dtype=jnp.float32)

    out = bn_relu_conv1x1(x, gamma, beta, conv_w)
    out = jax.block_until_ready(out)

    # Pure-JAX f32 reference (training-mode BN statistics, biased variance).
    mean = jnp.mean(x, axis=(0, 2, 3), keepdims=True)
    var = jnp.mean((x - mean) ** 2, axis=(0, 2, 3), keepdims=True)
    y_ref = (x - mean) * jax.lax.rsqrt(var + EPS)
    y_ref = y_ref * gamma.reshape(1, Cin, 1, 1) + beta.reshape(1, Cin, 1, 1)
    y_ref = jnp.maximum(y_ref, 0.0)
    ref = jnp.einsum("nchw,kc->nkhw", y_ref, conv_w.reshape(Cout, Cin))

    assert out.shape == (N, Cout, H, W), out.shape
    # Tolerance loosened for the bf16 MXU path (K=256 bf16 matmul, f32 accumulation).
    assert jnp.allclose(out, ref, atol=5e-2, rtol=5e-2), float(
        jnp.max(jnp.abs(out - ref))
    )

    print("KERNEL_OK")
</pallas_src>

<mosaic_0001>
module attributes {stable_mosaic.version = 11 : i64} {
  func.func @bn_relu_conv1x1_kernel(%arg0: i32, %arg1: memref<196x256xf32, #tpu.memory_space<vmem>>, %arg2: memref<1x256xf32, #tpu.memory_space<vmem>>, %arg3: memref<1x256xf32, #tpu.memory_space<vmem>>, %arg4: memref<256x256xbf16, #tpu.memory_space<vmem>>, %arg5: memref<196x256xf32, #tpu.memory_space<vmem>>, %arg6: memref<196x256xbf16, #tpu.memory_space<vmem>>) attributes {dimension_semantics = [#tpu.dimension_semantics<arbitrary>], iteration_bounds = array<i64: 4>, scalar_prefetch = 0 : i64, scratch_operands = 1 : i64, tpu.core_type = #tpu.core_type<tc>, window_params = [{pipeline_mode = #tpu.pipeline_mode<synchronous>, transform_indices = @transform_0, window_bounds = array<i64: 196, 256>}, {pipeline_mode = #tpu.pipeline_mode<synchronous>, transform_indices = @transform_1, window_bounds = array<i64: 1, 256>}, {pipeline_mode = #tpu.pipeline_mode<synchronous>, transform_indices = @transform_2, window_bounds = array<i64: 1, 256>}, {transform_indices = @transform_3, window_bounds = array<i64: 256, 256>}, {transform_indices = @transform_4, window_bounds = array<i64: 196, 256>}]} {
    %c0_i32 = arith.constant 0 : i32
    %0 = arith.cmpi eq, %arg0, %c0_i32 : i32
    %1 = arith.extui %0 : i1 to i32
    %c0_i32_0 = arith.constant 0 : i32
    %2 = arith.cmpi ne, %1, %c0_i32_0 : i32
    scf.if %2 {
      %c0_6 = arith.constant 0 : index
      %c0_7 = arith.constant 0 : index
      %7 = vector.load %arg1[%c0_6, %c0_7] : memref<196x256xf32, #tpu.memory_space<vmem>>, vector<196x256xf32>
      %cst_8 = arith.constant dense<0.000000e+00> : vector<256xf32>
      %8 = vector.multi_reduction <add>, %7, %cst_8 [0] : vector<196x256xf32> to vector<256xf32>
      %9 = vector.shape_cast %8 : vector<256xf32> to vector<1x256xf32>
      %cst_9 = arith.constant 0.00510204071 : f32
      %10 = vector.broadcast %cst_9 : f32 to vector<1x256xf32>
      %11 = arith.mulf %9, %10 : vector<1x256xf32>
      %12 = arith.mulf %7, %7 : vector<196x256xf32>
      %cst_10 = arith.constant dense<0.000000e+00> : vector<256xf32>
      %13 = vector.multi_reduction <add>, %12, %cst_10 [0] : vector<196x256xf32> to vector<256xf32>
      %14 = vector.shape_cast %13 : vector<256xf32> to vector<1x256xf32>
      %cst_11 = arith.constant 0.00510204071 : f32
      %15 = vector.broadcast %cst_11 : f32 to vector<1x256xf32>
      %16 = arith.mulf %14, %15 : vector<1x256xf32>
      %17 = arith.mulf %11, %11 : vector<1x256xf32>
      %18 = arith.subf %16, %17 : vector<1x256xf32>
      %cst_12 = arith.constant 9.99999974E-6 : f32
      %19 = vector.broadcast %cst_12 : f32 to vector<1x256xf32>
      %20 = arith.addf %18, %19 : vector<1x256xf32>
      %21 = math.rsqrt %20 : vector<1x256xf32>
      %c0_13 = arith.constant 0 : index
      %c0_14 = arith.constant 0 : index
      %22 = vector.load %arg2[%c0_13, %c0_14] : memref<1x256xf32, #tpu.memory_space<vmem>>, vector<1x256xf32>
      %23 = arith.mulf %21, %22 : vector<1x256xf32>
      %c0_15 = arith.constant 0 : index
      %c0_16 = arith.constant 0 : index
      %24 = vector.load %arg3[%c0_15, %c0_16] : memref<1x256xf32, #tpu.memory_space<vmem>>, vector<1x256xf32>
      %25 = arith.mulf %11, %23 : vector<1x256xf32>
      %26 = arith.subf %24, %25 : vector<1x256xf32>
      %27 = vector.broadcast %23 : vector<1x256xf32> to vector<196x256xf32>
      %28 = arith.mulf %7, %27 : vector<196x256xf32>
      %29 = vector.broadcast %26 : vector<1x256xf32> to vector<196x256xf32>
      %30 = arith.addf %28, %29 : vector<196x256xf32>
      %cst_17 = arith.constant 0.000000e+00 : f32
      %31 = vector.broadcast %cst_17 : f32 to vector<196x256xf32>
      %32 = arith.maximumf %30, %31 : vector<196x256xf32>
      %33 = arith.truncf %32 : vector<196x256xf32> to vector<196x256xbf16>
      %c0_18 = arith.constant 0 : index
      %c0_19 = arith.constant 0 : index
      %34 = vector.load %arg6[%c0_18, %c0_19] : memref<196x256xbf16, #tpu.memory_space<vmem>>, vector<196x256xbf16>
      tpu.vector_store %arg6[%c0_18, %c0_19], %33 {strides = array<i32>} : memref<196x256xbf16, #tpu.memory_space<vmem>>, vector<196x256xbf16>,
    } else {
    }
    %c0 = arith.constant 0 : index
    %c0_1 = arith.constant 0 : index
    %3 = vector.load %arg6[%c0, %c0_1] : memref<196x256xbf16, #tpu.memory_space<vmem>>, vector<196x256xbf16>
    %c0_2 = arith.constant 0 : index
    %c0_3 = arith.constant 0 : index
    %4 = vector.load %arg4[%c0_2, %c0_3] : memref<256x256xbf16, #tpu.memory_space<vmem>>, vector<256x256xbf16>
    %cst = arith.constant dense<0.000000e+00> : vector<196x256xf32>
    %5 = tpu.matmul %3, %4, %cst {dimension_numbers = #tpu.dot_dimension_numbers<[1], [0], [0], [1], [0, 0, 1, 1], [], []>} : vector<196x256xbf16>, vector<256x256xbf16>, vector<196x256xf32> -> vector<196x256xf32>
    %c0_4 = arith.constant 0 : index
    %c0_5 = arith.constant 0 : index
    %6 = vector.load %arg5[%c0_4, %c0_5] : memref<196x256xf32, #tpu.memory_space<vmem>>, vector<196x256xf32>
    tpu.vector_store %arg5[%c0_4, %c0_5], %5 {strides = array<i32>} : memref<196x256xf32, #tpu.memory_space<vmem>>, vector<196x256xf32>,
    return
  }
  func.func @transform_0(%arg0: i32) -> (i32, i32) {
    %c0_i32 = arith.constant 0 : i32
    %c0_i32_0 = arith.constant 0 : i32
    %c0_i32_1 = arith.constant 0 : i32
    return %c0_i32, %c0_i32_0 : i32, i32
  }
  func.func @transform_1(%arg0: i32) -> (i32, i32) {
    %c0_i32 = arith.constant 0 : i32
    %c0_i32_0 = arith.constant 0 : i32
    %c0_i32_1 = arith.constant 0 : i32
    return %c0_i32, %c0_i32_0 : i32, i32
  }
  func.func @transform_2(%arg0: i32) -> (i32, i32) {
    %c0_i32 = arith.constant 0 : i32
    %c0_i32_0 = arith.constant 0 : i32
    %c0_i32_1 = arith.constant 0 : i32
    return %c0_i32, %c0_i32_0 : i32, i32
  }
  func.func @transform_3(%arg0: i32) -> (i32, i32) {
    %c0_i32 = arith.constant 0 : i32
    %c0_i32_0 = arith.constant 0 : i32
    return %c0_i32, %arg0 : i32, i32
  }
  func.func @transform_4(%arg0: i32) -> (i32, i32) {
    %c0_i32 = arith.constant 0 : i32
    %c0_i32_0 = arith.constant 0 : i32
    return %c0_i32, %arg0 : i32, i32
  }
}

</mosaic_0001>

<bundles_post_ra>
// kernel: tpu_custom_call.1
= control target key start
LH: loop header
LB: loop body
LE: loop exit
PB: predicated region body
PF: predicated region fallthrough
CT: control target
= control target key end

     0   :  { %s2883_s0 = inlined_call_operand.hbm [shape: f32[196,256], index: 0, kind: input, shape index: {}]   ;;  %s2884_s1 = inlined_call_operand.hbm [shape: f32[1,256], index: 1, kind: input, shape index: {}]   ;;  %s2885_s2 = inlined_call_operand.hbm [shape: f32[1,256], index: 2, kind: input, shape index: {}]   ;;  %s2886_s3 = inlined_call_operand.hbm [shape: bf16[256,1024], index: 3, kind: input, shape index: {}]   ;;  %s2887_s4 = inlined_call_operand.hbm [shape: f32[196,1024], index: 4, kind: output, shape index: {}]  }
   0x1   :  { %2905 = sst [smem:[#allocation33_spill]] %s2883_s0 }
   0x2   :  { %2906 = sst [smem:[#allocation34_spill]] %s2884_s1 }
   0x3   :  { %2907 = sst [smem:[#allocation35_spill]] %s2885_s2 }
   0x4   :  { %9 = vsyncpa [#allocation4], 0 }
   0x5   :  { %10 = vsyncpa [#allocation7], 0 }
   0x6   :  { %11 = vsyncpa [#allocation10], 0 }
   0x7   :  { %13 = vsyncpa [#allocation10 + $0x1], 0 }
   0x8   :  { %14 = vsyncpa [#allocation5], 0 }
   0x9   :  { %16 = vsyncpa [#allocation5 + $0x1], 0  ;;  %s2179_s15 = smov 0   ;;  %s2181_s16 = smov 0  }
   0xa   :  { %s2183_s17 = smov 0   ;;  %s2185_s18 = smov 0  }
   0xb LB: > { %s2200_s19 = sadd.s32 4294967295, %s2141_s18   ;;  %s1556_s20 = sadd.s32 4294967294, %s2141_s18   ;;  %s2141_s18 = sphi %s2185_s18, %s2956_s18   ;;  %s2137_s17 = sphi %s2183_s17, %s2955_s17   ;;  %s2133_s16 = sphi %s2181_s16, %s2954_s16   ;;  %s2129_s15 = sphi %s2179_s15, %s2953_s15  }
   0xc   : > { %s2204_s21 = sadd.s32 1, %s2141_s18   ;;  %s92_s22 = sadd.s32 1, %s2137_s17 }
   0xd   : > { %s89_s23 = ssub.s32 %s2141_s18, %s2204_s21  ;;  %p99_p0 = scmp.ne.s32.totalorder %s2137_s17, %s2133_s16 }
   0xe   : > { %p90_p1 = scmp.eq.s32.totalorder %s89_s23, 0  ;;  %p100_p2 = scmp.eq.s32.totalorder %s2141_s18, 0 }
   0xf   : > { %p105_p3 = scmp.ne.s32.totalorder %s2133_s16, %s2129_s15  ;;  %p106_p4 = scmp.eq.s32.totalorder %s2200_s19, 0 }
  0x10   : > { %s2216_s24 = scalar_select %p90_p1, %s2137_s17, %s92_s22  }
  0x11   : > { %p2218_p5 = por %p100_p2, %p99_p0  ;;  %p2224_p6 = por %p106_p4, %p105_p3 }
  0x12   : > { %p129_p7 = scmp.eq.s32.totalorder %s2200_s19, 3  ;;  %p135_p8 = scmp.eq.s32.totalorder %s1556_s20, 3 }
  0x13   : > { %p1557_p9 = scmp.ge.s32.totalorder %s2141_s18, 1  ;;  %p142_p10 = scmp.lt.s32.totalorder %s2141_s18, 5 }
  0x14   : > { %p2231_p11 = por %p129_p7, %p99_p0  ;;  %p2235_p12 = por %p135_p8, %p105_p3 }
  0x15   : > { %p2239_p13 = pnand %p1557_p9, %p142_p10  ;;  %s2913_s1 = sld [smem:[#allocation34_spill]] }
  0x16   : > { %s2143_s7 = smov [#allocation6]   ;;  %p1895_p3 = scmp.lt.s32.totalorder %s2141_s18, 4 }
  0x17   : > { %p1874_p2 = pneg %p2239_p13  ;;  %s170_s8 = sshll.u32 %s2143_s7, 4  ;;  %s171_s8 = int_to_ptr.vmem [resolvable:$true] %s170_s8 }
  0x18   : > { %s2915_s0 = sld [smem:[#allocation33_spill]]  ;;  %p2263_p7 = pnand %p1895_p3, %p2218_p5 }
  0x19   : > { %p2251_p0 = pnand %p1874_p2, %p106_p4  ;;  %s2144_s14 = smov [#allocation3]  }
  0x1a   : > { %s155_s20 = sshll.u32 %s2144_s14, 4  ;;  %s2917_s2 = sld [smem:[#allocation35_spill]]  ;;  %s156_s20 = int_to_ptr.vmem [resolvable:$true] %s155_s20 }
  0x1b   : > { %s168_s6 = sshll.u32 %s2913_s1, 4  ;;  %s2145_s5 = smov 256   ;;  %s169_s6 = int_to_ptr.hbm [resolvable:$true] %s168_s6 }
  0x1c   : > { %1880 = dma.hbm_to_vmem [thread:$0]  (!%p2251_p0), %s169_s6, 32, %s171_s8, [#allocation7]  }
  0x1d   : > { %s2146_s7 = smov 16   ;;  %s2147_s10 = smov [#allocation8]  }
  0x1e   : > { %s153_s12 = sshll.u32 %s2915_s0, 4  ;;  %s182_s6 = sshll.u32 %s2147_s10, 4  ;;  %s154_s12 = int_to_ptr.hbm [resolvable:$true] %s153_s12  ;;  %s183_s6 = int_to_ptr.vmem [resolvable:$true] %s182_s6 }
  0x1f   : > { %1877 = dma.hbm_to_vmem [thread:$0]  (!%p2251_p0), %s154_s12, 6400, %s156_s20, [#allocation4], %s2145_s5, %s2145_s5, %s2146_s7  }
  0x20   : > { %s180_s30 = sshll.u32 %s2917_s2, 4  ;;  %s193_s25 = sand.u32 1, %s2137_s17   ;;  %s181_s30 = int_to_ptr.hbm [resolvable:$true] %s180_s30 }
  0x21   : > { %1883 = dma.hbm_to_vmem [thread:$0]  (!%p2251_p0), %s181_s30, 32, %s183_s6, [#allocation7]  }
  0x22   : > { %s1562_s8 = sshll.u32 %s193_s25, 8  ;;  %s1799_s11 = sshll.u32 %s2141_s18, 3 }
  0x23   : > { %s202_s1 = scalar_lea.hbm %s2886_s3, %s1799_s11  ;;  %s197_s23 = scalar_lea.vmem [#allocation9], %s1562_s8 }
  0x24   : > { %s203_s22 = sshll.u32 %s202_s1, 4  ;;  %s205_s2 = sshll.u32 %s197_s23, 4  ;;  %s204_s22 = int_to_ptr.hbm [resolvable:$true] %s203_s22  ;;  %s206_s2 = int_to_ptr.vmem [resolvable:$true] %s205_s2 }
  0x25   : > { %s194_s12 = scalar_lea.sflag [#allocation10], %s193_s25  ;;  %s2037_s20 = sshra.s32 %s204_s22, 4  ;;  %s2038_s20 = int_to_ptr.hbm [resolvable:$true] %s2037_s20 }
  0x26   : > { %s2039_s5 = scalar_lea.hbm %s2038_s20, 256  ;;  %p2041_p8 = pneg %p2263_p7 }
  0x27   : > { %p2040_p5 = scmp.ne.s32.totalorder %s2038_s20, %s2039_s5  ;;  %s2044_s7 = scalar_lea.hbm %s2886_s3, 1024 }
  0x28   : > { %p2045_p2 = scmp.lt.s32.totalorder %s2038_s20, %s2886_s3  ;;  %p2046_p0 = scmp.lt.s32.totalorder %s2044_s7, %s2039_s5 }
  0x29   : > { %p2042_p9 = pnand %p2041_p8, %p2040_p5 }
  0x2a   : > { %p2047_p3 = por %p2046_p0, %p2045_p2 }
  0x2b   : > { %p2043_p10 = pneg %p2042_p9 }
  0x2d   : > { %p2048_p1 = pnand %p2047_p3, %p2043_p10 }
  0x2f   : > { %2051 = shalt.err (!%p2048_p1)
}
  0x30   : > { %s2148_s1 = smov 512   ;;  %s2149_s6 = smov 128  }
  0x31   : > { %s2150_s25 = smov 8   ;;  %217 = sbr.rel (%p2239_p13) target bundleno = 590 (0x24e), region = 36 }
  0x32   : > { %1887 = dma.hbm_to_vmem [thread:$0]  (!%p2263_p7), %s204_s22, 4096, %s206_s2, %s194_s12, %s2148_s1, %s2149_s6, %s2150_s25  }
  0x36   : > { %2112 = dma.done.wait (%p106_p4), [#allocation4], 6400  }
  0x37   : > { %2114 = vsyncadd (%p106_p4), [#allocation4], 4294960896 }
  0x38   : > { %2116 = dma.done.wait (%p106_p4), [#allocation7], 64  }
  0x39   : > { %2118 = vsyncadd (%p106_p4), [#allocation7], 4294967232  ;;  %s2300_s8 = sand.u32 1, %s2133_s16  }
  0x3a   : > { %s1569_s2 = sshll.u32 %s2300_s8, 8  ;;  %s235_s29 = scalar_lea.sflag [#allocation10], %s2300_s8 }
  0x3b   : > { %s2304_s13 = scalar_lea.vmem [#allocation9], %s1569_s2 }
  0x3c   : > { %2120 = dma.done.wait (%p2224_p6), %s235_s29, 4096  }
  0x3d   : > { %2122 = vsyncadd (%p2224_p6), %s235_s29, 4294963200  ;;  %s1857_s11 = smul.u32 400, %s2300_s8  ;;  %p2918_p4 = scmp.ne.s32.totalorder %s2200_s19, 0 }
  0x3f   : > { %s2311_s14 = scalar_lea.vmem [#allocation11], %s1857_s11  ;;  %269 = sbr.rel (%p2918_p4) target bundleno = 222 (0xde), region = 56 }
  0x44   : > { %v2315_v0 = vld [vmem:[#allocation3] sm:$0xff]  ;;  %v2317_v1 = vld [vmem:[#allocation3 + $0x8] sm:$0xff]  ;;  %v2319_v2 = vld [vmem:[#allocation3 + $0x10] sm:$0xff]  ;;  %vm343_vm0 = vcmask 1043456   ;;  %vm539_vm7 = vcmask 1040384  }
  0x45   : > { %v2321_v3 = vld [vmem:[#allocation3 + $0x18] sm:$0xff]  ;;  %v2323_v4 = vld [vmem:[#allocation3 + $0x20] sm:$0xff]  ;;  %v2325_v5 = vld [vmem:[#allocation3 + $0x28] sm:$0xff]  ;;  %v320_v6 = vadd.f32 %v2319_v2, %v2315_v0  ;;  %v385_v33 = vmul.f32 %v2315_v0, %v2315_v0  ;;  %v387_v34 = vmul.f32 %v2319_v2, %v2319_v2  ;;  %v386_v37 = vmul.f32 %v2317_v1, %v2317_v1 }
  0x46   : > { %v2329_v7 = vld [vmem:[#allocation3 + $0x30] sm:$0xff]  ;;  %v352_v8 = vadd.f32 %v2321_v3, %v2317_v1  ;;  %v2333_v9 = vld [vmem:[#allocation3 + $0x38] sm:$0xff]  ;;  %v2336_v11 = vld [vmem:[#allocation3 + $0x40] sm:$0xff]  ;;  %v388_v38 = vmul.f32 %v2321_v3, %v2321_v3  ;;  %v389_v41 = vmul.f32 %v2323_v4, %v2323_v4  ;;  %v390_v44 = vmul.f32 %v2325_v5, %v2325_v5 }
  0x47   : > { %v321_v10 = vadd.f32 %v320_v6, %v2323_v4  ;;  %v2339_v13 = vld [vmem:[#allocation3 + $0x48] sm:$0xff]  ;;  %v2342_v15 = vld [vmem:[#allocation3 + $0x50] sm:$0xff]  ;;  %v2345_v17 = vld [vmem:[#allocation3 + $0x58] sm:$0xff]  ;;  %v391_v47 = vmul.f32 %v2329_v7, %v2329_v7  ;;  %v435_v48 = vadd.f32 %v387_v34, %v385_v33  ;;  %v392_v51 = vmul.f32 %v2333_v9, %v2333_v9 }
  0x48   : > { %v353_v12 = vadd.f32 %v352_v8, %v2325_v5  ;;  %v2348_v19 = vld [vmem:[#allocation3 + $0x60] sm:$0xff]  ;;  %v2351_v21 = vld [vmem:[#allocation3 + $0x68] sm:$0xff]  ;;  %v2354_v23 = vld [vmem:[#allocation3 + $0x70] sm:$0xff]  ;;  %v466_v52 = vadd.f32 %v388_v38, %v386_v37  ;;  %v393_v55 = vmul.f32 %v2336_v11, %v2336_v11  ;;  %v394_v59 = vmul.f32 %v2339_v13, %v2339_v13 }
  0x49   : > { %v322_v14 = vadd.f32 %v321_v10, %v2329_v7  ;;  %v2357_v25 = vld [vmem:[#allocation3 + $0x78] sm:$0xff]  ;;  %v2360_v27 = vld [vmem:[#allocation3 + $0x80] sm:$0xff]  ;;  %v2363_v29 = vld [vmem:[#allocation3 + $0x88] sm:$0xff]  ;;  %v436_v56 = vadd.f32 %v435_v48, %v389_v41  ;;  %v395_v63 = vmul.f32 %v2342_v15, %v2342_v15  ;;  %v399_v34 = vmul.f32 %v2354_v23, %v2354_v23 }
  0x4a   : > { %v354_v16 = vadd.f32 %v353_v12, %v2333_v9  ;;  %v2366_v31 = vld [vmem:[#allocation3 + $0x90] sm:$0xff]  ;;  %v2373_v35 = vld [vmem:[#allocation3 + $0x98] sm:$0xff]  ;;  %v2380_v39 = vld [vmem:[#allocation3 + $0xa0] sm:$0xff]  ;;  %v467_v60 = vadd.f32 %v466_v52, %v390_v44  ;;  %v396_v12 = vmul.f32 %v2345_v17, %v2345_v17 }
  0x4b   : > { %v323_v18 = vadd.f32 %v322_v14, %v2336_v11  ;;  %v2385_v42 = vld [vmem:[#allocation3 + $0xa8] sm:$0xff]  ;;  %v2390_v45 = vld [vmem:[#allocation3 + $0xb0] sm:$0xff]  ;;  %v2395_v49 = vld [vmem:[#allocation3 + $0xb8] sm:$0xff]  ;;  %v437_v6 = vadd.f32 %v436_v56, %v391_v47  ;;  %v403_v56 = vmul.f32 %v2366_v31, %v2366_v31 }
  0x4c   : > { %v355_v20 = vadd.f32 %v354_v16, %v2339_v13  ;;  %v2400_v53 = vld [vmem:[#allocation3 + $0xc0] sm:$0xff]  ;;  %v2405_v57 = vld [vmem:[#allocation3 + $0xc8] sm:$0xff]  ;;  %v2410_v61 = vld [vmem:[#allocation3 + $0xd0] sm:$0xff]  ;;  %v468_v14 = vadd.f32 %v467_v60, %v392_v51  ;;  %v402_v51 = vmul.f32 %v2363_v29, %v2363_v29 }
  0x4d   : > { %v324_v22 = vadd.f32 %v323_v18, %v2342_v15  ;;  %2919 = vst [vmem:[#allocation16_spill] sm:$0xff] %v2405_v57  ;;  %v2415_v8 = vld [vmem:[#allocation3 + $0xd8] sm:$0xff]  ;;  %v2420_v16 = vld [vmem:[#allocation3 + $0xe0] sm:$0xff]  ;;  %v2445_v48 = vld [vmem:[#allocation3 + $0x108] sm:$0xff] }
  0x4e   : > { %v356_v24 = vadd.f32 %v355_v20, %v2345_v17  ;;  %2920 = vst [vmem:[#allocation17_spill] sm:$0xff] %v2410_v61  ;;  %v397_v20 = vmul.f32 %v2348_v19, %v2348_v19  ;;  %v2435_v37 = vld [vmem:[#allocation3 + $0xf8] sm:$0xff] }
  0x4f   : > { %v325_v26 = vadd.f32 %v324_v22, %v2348_v19  ;;  %2921 = vst [vmem:[#allocation18_spill] sm:$0xff] %v2415_v8  ;;  %v438_v22 = vadd.f32 %v437_v6, %v393_v55  ;;  %v2460_v6 = vld [vmem:[#allocation3 + $0x120] sm:$0xff] }
  0x50   : > { %v357_v28 = vadd.f32 %v356_v24, %v2351_v21  ;;  %2922 = vst [vmem:[#allocation19_spill] sm:$0xff] %v2420_v16  ;;  %v2425_v24 = vld [vmem:[#allocation3 + $0xe8] sm:$0xff] }
  0x51   : > { %v326_v30 = vadd.f32 %v325_v26, %v2354_v23  ;;  %2923 = vst [vmem:[#allocation20_spill] sm:$0xff] %v2425_v24 }
  0x52   : > { %v358_v32 = vadd.f32 %v357_v28, %v2357_v25  ;;  %v398_v28 = vmul.f32 %v2351_v21, %v2351_v21  ;;  %2925 = vst [vmem:[#allocation22_spill] sm:$0xff] %v2435_v37 }
  0x53   : > { %v327_v36 = vadd.f32 %v326_v30, %v2360_v27  ;;  %v469_v30 = vadd.f32 %v468_v14, %v394_v59  ;;  %v2455_v59 = vld [vmem:[#allocation3 + $0x118] sm:$0xff] }
  0x54   : > { %v359_v40 = vadd.f32 %v358_v32, %v2363_v29  ;;  %v2430_v32 = vld [vmem:[#allocation3 + $0xf0] sm:$0xff] }
  0x55   : > { %v328_v43 = vadd.f32 %v327_v36, %v2366_v31  ;;  %2924 = vst [vmem:[#allocation21_spill] sm:$0xff] %v2430_v32  ;;  %v439_v36 = vadd.f32 %v438_v22, %v395_v63  ;;  %v470_v41 = vadd.f32 %v469_v30, %v396_v12  ;;  %v405_v12 = vmul.f32 %v2380_v39, %v2380_v39 }
  0x56   : > { %v360_v46 = vadd.f32 %v359_v40, %v2373_v35  ;;  %v400_v40 = vmul.f32 %v2357_v25, %v2357_v25  ;;  %v406_v22 = vmul.f32 %v2385_v42, %v2385_v42 }
  0x57   : > { %v329_v50 = vadd.f32 %v328_v43, %v2380_v39  ;;  %v2440_v43 = vld [vmem:[#allocation3 + $0x100] sm:$0xff]  ;;  %v440_v47 = vadd.f32 %v439_v36, %v397_v20  ;;  %v471_v52 = vadd.f32 %v470_v41, %v398_v28  ;;  %v2470_v28 = vld [vmem:[#allocation3 + $0x130] sm:$0xff]  ;;  %v2475_v36 = vld [vmem:[#allocation3 + $0x138] sm:$0xff] }
  0x58   : > { %v361_v54 = vadd.f32 %v360_v46, %v2385_v42  ;;  %2926 = vst [vmem:[#allocation23_spill] sm:$0xff] %v2440_v43  ;;  %v401_v46 = vmul.f32 %v2360_v27, %v2360_v27 }
  0x59   : > { %v330_v58 = vadd.f32 %v329_v50, %v2390_v45  ;;  %v472_v63 = vadd.f32 %v471_v52, %v400_v40  ;;  %v408_v40 = vmul.f32 %v2395_v49, %v2395_v49 }
  0x5a   : > { %v362_v62 = vadd.f32 %v361_v54, %v2395_v49  ;;  %v2450_v54 = vld [vmem:[#allocation3 + $0x110] sm:$0xff] }
  0x5b   : > { %v331_v10 = vadd.f32 %v330_v58, %v2400_v53  ;;  %2927 = vst [vmem:[#allocation24_spill] sm:$0xff] %v2450_v54  ;;  %v441_v58 = vadd.f32 %v440_v47, %v399_v34  ;;  %v409_v47 = vmul.f32 %v2400_v53, %v2400_v53 }
  0x5c   : > { %v363_v18 = vadd.f32 %v362_v62, %v2405_v57  ;;  %v404_v62 = vmul.f32 %v2373_v35, %v2373_v35 }
  0x5d   : > { %v332_v26 = vadd.f32 %v331_v10, %v2410_v61  ;;  %v442_v14 = vadd.f32 %v441_v58, %v401_v46  ;;  %v2490_v58 = vld [vmem:[#allocation3 + $0x150] sm:$0xff] }
  0x5e   : > { %v364_v33 = vadd.f32 %v363_v18, %v2415_v8  ;;  %v2465_v18 = vld [vmem:[#allocation3 + $0x128] sm:$0xff]  ;;  %2928 = vst [vmem:[#allocation25_spill] sm:$0xff] %v2490_v58 }
  0x5f   : > { %v333_v38 = vadd.f32 %v332_v26, %v2420_v16  ;;  %v473_v26 = vadd.f32 %v472_v63, %v402_v51  ;;  %v443_v34 = vadd.f32 %v442_v14, %v403_v56  ;;  %v2485_v51 = vld [vmem:[#allocation3 + $0x148] sm:$0xff]  ;;  %v412_v14 = vmul.f32 %v2415_v8, %v2415_v8 }
  0x60   : > { %v365_v44 = vadd.f32 %v364_v33, %v2425_v24  ;;  %v407_v33 = vmul.f32 %v2390_v45, %v2390_v45 }
  0x61   : > { %v334_v50 = vadd.f32 %v333_v38, %v2430_v32  ;;  %v474_v41 = vadd.f32 %v473_v26, %v404_v62  ;;  %v411_v62 = vmul.f32 %v2410_v61, %v2410_v61  ;;  %v2500_v26 = vld [vmem:[#allocation3 + $0x160] sm:$0xff] }
  0x62   : > { %v366_v55 = vadd.f32 %v365_v44, %v2435_v37  ;;  %v2480_v44 = vld [vmem:[#allocation3 + $0x140] sm:$0xff]  ;;  %2930 = vst [vmem:[#allocation27_spill] sm:$0xff] %v2500_v26 }
  0x63   : > { %v335_v60 = vadd.f32 %v334_v50, %v2440_v43  ;;  %v444_v50 = vadd.f32 %v443_v34, %v405_v12  ;;  %v475_v56 = vadd.f32 %v474_v41, %v406_v22  ;;  %v2507_v41 = vld [vmem:[#allocation3 + $0x180] sm:$0xf] }
  0x64   : > { %v367_v10 = vadd.f32 %v366_v55, %v2445_v48  ;;  %v410_v55 = vmul.f32 %v2405_v57, %v2405_v57  ;;  %2932 = vst [vmem:[#allocation29_spill] sm:$0xff] %v2507_v41 }
  0x65   : > { %v336_v20 = vadd.f32 %v335_v60, %v2450_v54  ;;  %v445_v63 = vadd.f32 %v444_v50, %v407_v33 }
  0x66   : > { %v368_v30 = vadd.f32 %v367_v10, %v2455_v59  ;;  %v2495_v10 = vld [vmem:[#allocation3 + $0x158] sm:$0xff] }
  0x67   : > { %v337_v38 = vadd.f32 %v336_v20, %v2460_v6  ;;  %2929 = vst [vmem:[#allocation26_spill] sm:$0xff] %v2495_v10  ;;  %v476_v20 = vadd.f32 %v475_v56, %v408_v40  ;;  %v446_v34 = vadd.f32 %v445_v63, %v409_v47  ;;  %v2514_v40 = vld [vmem:[#allocation3 + $0x188] sm:$0xf]  ;;  %v415_v47 = vmul.f32 %v2430_v32, %v2430_v32  ;;  %v2519_v63 = vld [vmem:[#allocation3 + $0x178] sm:$0xff] }
  0x68   : > { %v369_v46 = vadd.f32 %v368_v30, %v2465_v18  ;;  %v413_v30 = vmul.f32 %v2420_v16, %v2420_v16  ;;  %2934 = vst [vmem:[#allocation31_spill] sm:$0xff] %v2514_v40 }
  0x69   : > { %v338_v52 = vadd.f32 %v337_v38, %v2470_v28  ;;  %v2505_v38 = vld [vmem:[#allocation3 + $0x168] sm:$0xff]  ;;  %v477_v50 = vadd.f32 %v476_v20, %v410_v55  ;;  %2935 = vst [vmem:[#allocation32_spill] sm:$0xff] %v2519_v63  ;;  %v344_v55 = vsel %vm343_vm0, %v2507_v41, 0.0 }
  0x6a   : > { %v370_v60 = vadd.f32 %v369_v46, %v2475_v36  ;;  %2931 = vst [vmem:[#allocation28_spill] sm:$0xff] %v2505_v38  ;;  %v414_v46 = vmul.f32 %v2425_v24, %v2425_v24 }
  0x6b   : > { %v339_v12 = vadd.f32 %v338_v52, %v2480_v44  ;;  %v2512_v52 = vld [vmem:[#allocation3 + $0x170] sm:$0xff]  ;;  %v478_v24 = vadd.f32 %v477_v50, %v412_v14  ;;  %v419_v50 = vmul.f32 %v2450_v54, %v2450_v54  ;;  %v423_v54 = vmul.f32 %v2470_v28, %v2470_v28 }
  0x6c   : > { %v371_v22 = vadd.f32 %v370_v60, %v2485_v51  ;;  %2933 = vst [vmem:[#allocation30_spill] sm:$0xff] %v2512_v52  ;;  %v447_v60 = vadd.f32 %v446_v34, %v411_v62  ;;  %v375_v62 = vsel %vm343_vm0, %v2514_v40, 0.0  ;;  %v418_v34 = vmul.f32 %v2445_v48, %v2445_v48 }
  0x6d   : > { %v340_v33 = vadd.f32 %v339_v12, %v2490_v58  ;;  %v416_v12 = vmul.f32 %v2435_v37, %v2435_v37 }
  0x6e   : > { %v372_v56 = vadd.f32 %v371_v22, %v2495_v10  ;;  %v417_v22 = vmul.f32 %v2440_v43, %v2440_v43  ;;  %v448_v8 = vadd.f32 %v447_v60, %v413_v30  ;;  %v420_v43 = vmul.f32 %v2455_v59, %v2455_v59 }
  0x6f   : > { %v341_v16 = vadd.f32 %v340_v33, %v2500_v26  ;;  %v479_v33 = vadd.f32 %v478_v24, %v414_v46  ;;  %v422_v24 = vmul.f32 %v2465_v18, %v2465_v18 }
  0x70   : > { %v373_v20 = vadd.f32 %v372_v56, %v2505_v38  ;;  %v449_v37 = vadd.f32 %v448_v8, %v415_v47 }
  0x71   : > { %v342_v32 = vadd.f32 %v341_v16, %v2512_v52  ;;  %v480_v30 = vadd.f32 %v479_v33, %v416_v12  ;;  %v421_v16 = vmul.f32 %v2460_v6, %v2460_v6 }
  0x72   : > { %v374_v14 = vadd.f32 %v373_v20, %v2519_v63  ;;  %v450_v61 = vadd.f32 %v449_v37, %v417_v22  ;;  %v426_v22 = vmul.f32 %v2485_v51, %v2485_v51 }
  0x73   : > { %v345_v56 = vadd.f32 %v344_v55, %v342_v32  ;;  %v481_v46 = vadd.f32 %v480_v30, %v418_v34  ;;  %v424_v32 = vmul.f32 %v2475_v36, %v2475_v36  ;;  %v425_v55 = vmul.f32 %v2480_v44, %v2480_v44 }
  0x74   : > { %v376_v60 = vadd.f32 %v375_v62, %v374_v14  ;;  %v451_v8 = vadd.f32 %v450_v61, %v419_v50  ;;  %v427_v34 = vmul.f32 %v2490_v58, %v2490_v58  ;;  %v428_v61 = vmul.f32 %v2495_v10, %v2495_v10 }
  0x75   : > { %v346_v57 = vrot.slane %v345_v56, 4  ;;  %v482_v47 = vadd.f32 %v481_v46, %v420_v43  ;;  %v434_v46 = vmul.f32 %v2514_v40, %v2514_v40 }
  0x76   : > { %v377_v20 = vrot.slane %v376_v60, 4  ;;  %v452_v62 = vadd.f32 %v451_v8, %v421_v16  ;;  %v433_v16 = vmul.f32 %v2507_v41, %v2507_v41  ;;  %v432_v8 = vmul.f32 %v2519_v63, %v2519_v63 }
  0x77   : > { %v347_v12 = vadd.f32 %v346_v57, %v345_v56  ;;  %v483_v33 = vadd.f32 %v482_v47, %v422_v24  ;;  %v429_v57 = vmul.f32 %v2500_v26, %v2500_v26 }
  0x78   : > { %v378_v37 = vadd.f32 %v377_v20, %v376_v60  ;;  %v453_v14 = vadd.f32 %v452_v62, %v423_v54  ;;  %v430_v60 = vmul.f32 %v2505_v38, %v2505_v38  ;;  %v431_v54 = vmul.f32 %v2512_v52, %v2512_v52 }
  0x79   : > { %v484_v50 = vadd.f32 %v483_v33, %v424_v32  ;;  %v348_v30 = vrot.slane %v347_v12, 2  ;;  %v458_v33 = vsel %vm343_vm0, %v433_v16, 0.0 }
  0x7a   : > { %v454_v43 = vadd.f32 %v453_v14, %v425_v55  ;;  %v379_v56 = vrot.slane %v378_v37, 2 }
  0x7b   : > { %v485_v24 = vadd.f32 %v484_v50, %v426_v22  ;;  %v349_v47 = vadd.f32 %v348_v30, %v347_v12  ;;  %v489_v22 = vsel %vm343_vm0, %v434_v46, 0.0 }
  0x7c   : > { %v455_v20 = vadd.f32 %v454_v43, %v427_v34  ;;  %v380_v62 = vadd.f32 %v379_v56, %v378_v37 }
  0x7d   : > { %v486_v32 = vadd.f32 %v485_v24, %v428_v61  ;;  %v350_v41 = vrot.slane %v349_v47, 1 }
  0x7e   : > { %v456_v55 = vadd.f32 %v455_v20, %v429_v57  ;;  %v381_v26 = vrot.slane %v380_v62, 1 }
  0x7f   : > { %v487_v14 = vadd.f32 %v486_v32, %v430_v60  ;;  %v351_v43 = vadd.f32 %v350_v41, %v349_v47 }
  0x80   : > { %v457_v38 = vadd.f32 %v456_v55, %v431_v54  ;;  %v382_v63 = vadd.f32 %v381_v26, %v380_v62 }
  0x81   : > { %v488_v50 = vadd.f32 %v487_v14, %v432_v8  ;;  %v383_v37 = vmul.f32 0.0051020407, %v351_v43 }
  0x82   : > { %v459_v52 = vadd.f32 %v458_v33, %v457_v38  ;;  %v384_v56 = vmul.f32 0.0051020407, %v382_v63 }
  0x83   : > { %v490_v10 = vadd.f32 %v489_v22, %v488_v50  ;;  %v499_v46 = vmul.f32 %v383_v37, %v383_v37  ;;  %v525_v22 = vld [vmem:[#allocation6] sm:$0x3] }
  0x84   : > { %v460_v40 = vrot.slane %v459_v52, 4  ;;  %v500_v38 = vmul.f32 %v384_v56, %v384_v56  ;;  %v527_v43 = vperm.slane %v525_v22, 0 }
  0x85   : > { %v491_v34 = vrot.slane %v490_v10, 4 }
  0x86   : > { %v461_v58 = vadd.f32 %v460_v40, %v459_v52 }
  0x87   : > { %v492_v61 = vadd.f32 %v491_v34, %v490_v10 }
  0x88   : > { %v462_v12 = vrot.slane %v461_v58, 2 }
  0x89   : > { %v493_v30 = vrot.slane %v492_v61, 2 }
  0x8a   : > { %v463_v57 = vadd.f32 %v462_v12, %v461_v58  ;;  %v528_v12 = vperm.slane %v525_v22, 1 }
  0x8b   : > { %v494_v60 = vadd.f32 %v493_v30, %v492_v61 }
  0x8c   : > { %v464_v16 = vrot.slane %v463_v57, 1 }
  0x8d   : > { %v495_v24 = vrot.slane %v494_v60, 1 }
  0x8e   : > { %v465_v54 = vadd.f32 %v464_v16, %v463_v57 }
  0x8f   : > { %v496_v20 = vadd.f32 %v495_v24, %v494_v60 }
  0x90   : > { %v497_v8 = vmul.f32 0.0051020407, %v465_v54 }
  0x91   : > { %v498_v32 = vmul.f32 0.0051020407, %v496_v20 }
  0x92   : > { %v501_v55 = vsub.f32 %v497_v8, %v499_v46 }
  0x93   : > { %v502_v33 = vsub.f32 %v498_v32, %v500_v38 }
  0x94   : > { %v503_v41 = vadd.f32 1e-05, %v501_v55 }
  0x95   : > { %v504_v52 = vadd.f32 1e-05, %v502_v33 }
  0x96   : > { %1943 = vrsqrt.f32 %v503_v41  ;;  %vm511_vm1 = vweird.f32 %v503_v41 }
  0x97   : > { %1945 = vrsqrt.f32 %v504_v52  ;;  %vm521_vm3 = vweird.f32 %v504_v52 }
  0x9c   : > { %v1944_v10 = vpop.eup %1943 }
  0x9d   : > { %v1946_v26 = vpop.eup %1945  ;;  %v506_v40 = vmul.f32 %v1944_v10, %v503_v41  ;;  %vm512_vm2 = vweird.f32 %v1944_v10  ;;  %v533_v41 = vld [vmem:[#allocation8] sm:$0x3] }
  0x9e   : > { %v516_v58 = vmul.f32 %v1946_v26, %v504_v52  ;;  %vm522_vm4 = vweird.f32 %v1946_v26  ;;  %vm513_vm5 = vmor %vm511_vm1, %vm512_vm2 }
  0x9f   : > { %v507_v63 = vmul.f32 %v1944_v10, %v506_v40  ;;  %vm523_vm6 = vmor %vm521_vm3, %vm522_vm4 }
  0xa0   : > { %v517_v47 = vmul.f32 %v1946_v26, %v516_v58 }
  0xa1   : > { %v508_v62 = vmul.f32 0.5, %v507_v63  ;;  %v2937_v63 = vld [vmem:[#allocation17_spill] sm:$0xff] }
  0xa2   : > { %v518_v14 = vmul.f32 0.5, %v517_v47 }
  0xa3   : > { %v509_v50 = vsub.f32 1.5, %v508_v62 }
  0xa4   : > { %v519_v34 = vsub.f32 1.5, %v518_v14 }
  0xa5   : > { %v510_v61 = vmul.f32 %v1944_v10, %v509_v50 }
  0xa6   : > { %v520_v30 = vmul.f32 %v1946_v26, %v519_v34 }
  0xa7   : > { %v514_v57 = vsel %vm513_vm5, %v1944_v10, %v510_v61 }
  0xa8   : > { %v524_v60 = vsel %vm523_vm6, %v1946_v26, %v520_v30  ;;  %v531_v16 = vmul.f32 %v527_v43, %v514_v57 }
  0xa9   : > { %v532_v24 = vmul.f32 %v528_v12, %v524_v60 }
  0xaa   : > { %v2569_v54 = vperm.slane %v531_v16, 0  ;;  %v534_v46 = vmul.f32 %v531_v16, %v383_v37 }
  0xab   : > { %v535_v20 = vmul.f32 %v532_v24, %v384_v56  ;;  %v2571_v38 = vperm.slane %v532_v24, 0 }
  0xac   : > { %v545_v8 = vmul.f32 %v2569_v54, %v2315_v0  ;;  %v547_v32 = vmul.f32 %v2569_v54, %v2319_v2  ;;  %v549_v55 = vmul.f32 %v2569_v54, %v2323_v4  ;;  %v551_v33 = vmul.f32 %v2569_v54, %v2329_v7 }
  0xad   : > { %v538_v52 = vrot.slane %v535_v20, 7  ;;  %v546_v37 = vmul.f32 %v2571_v38, %v2317_v1  ;;  %v548_v56 = vmul.f32 %v2571_v38, %v2321_v3  ;;  %v550_v0 = vmul.f32 %v2571_v38, %v2325_v5 }
  0xae   : > { %v552_v2 = vmul.f32 %v2571_v38, %v2333_v9  ;;  %v553_v4 = vmul.f32 %v2569_v54, %v2336_v11  ;;  %v554_v7 = vmul.f32 %v2571_v38, %v2339_v13  ;;  %v555_v10 = vmul.f32 %v2569_v54, %v2342_v15 }
  0xaf   : > { %v540_v26 = vsel %vm539_vm7, %v534_v46, %v538_v52  ;;  %v556_v1 = vmul.f32 %v2571_v38, %v2345_v17  ;;  %v557_v3 = vmul.f32 %v2569_v54, %v2348_v19  ;;  %v558_v5 = vmul.f32 %v2571_v38, %v2351_v21 }
  0xb0   : > { %v542_v9 = vsub.f32 %v533_v41, %v540_v26  ;;  %v559_v11 = vmul.f32 %v2569_v54, %v2354_v23  ;;  %v560_v13 = vmul.f32 %v2571_v38, %v2357_v25  ;;  %v561_v15 = vmul.f32 %v2569_v54, %v2360_v27 }
  0xb1   : > { %v562_v40 = vmul.f32 %v2571_v38, %v2363_v29  ;;  %v563_v17 = vmul.f32 %v2569_v54, %v2366_v31  ;;  %v564_v19 = vmul.f32 %v2571_v38, %v2373_v35  ;;  %v565_v21 = vmul.f32 %v2569_v54, %v2380_v39  ;;  %v2936_v35 = vld [vmem:[#allocation16_spill] sm:$0xff] }
  0xb2   : > { %v2615_v58 = vperm.slane %v542_v9, 0  ;;  %v2617_v23 = vperm.slane %v542_v9, 1  ;;  %v566_v25 = vmul.f32 %v2571_v38, %v2385_v42  ;;  %v567_v27 = vmul.f32 %v2569_v54, %v2390_v45 }
  0xb3   : > { %v568_v29 = vmul.f32 %v2571_v38, %v2395_v49  ;;  %v2627_v31 = vmul.f32 %v2569_v54, %v2400_v53  ;;  %v2631_v39 = vmul.f32 %v2571_v38, %v2936_v35  ;;  %v2635_v47 = vmul.f32 %v2569_v54, %v2937_v63 }
  0xb4   : > { %v600_v42 = vadd.f32 %v2615_v58, %v545_v8  ;;  %v601_v62 = vadd.f32 %v2617_v23, %v546_v37  ;;  %v602_v45 = vadd.f32 %v2615_v58, %v547_v32  ;;  %v603_v49 = vadd.f32 %v2617_v23, %v548_v56 }
  0xb5   : > { %v604_v14 = vadd.f32 %v2615_v58, %v549_v55  ;;  %v605_v53 = vadd.f32 %v2617_v23, %v550_v0  ;;  %v606_v22 = vadd.f32 %v2615_v58, %v551_v33  ;;  %v607_v50 = vadd.f32 %v2617_v23, %v552_v2 }
  0xb6   : > { %v650_v34 = vmax.f32 %v600_v42, 0.0  ;;  %v651_v43 = vmax.f32 %v601_v62, 0.0  ;;  %v652_v61 = vmax.f32 %v602_v45, 0.0  ;;  %v653_v12 = vmax.f32 %v603_v49, 0.0 }
  0xb7   : > { %v654_v30 = vmax.f32 %v604_v14, 0.0  ;;  %v655_v57 = vmax.f32 %v605_v53, 0.0  ;;  %v656_v60 = vmax.f32 %v606_v22, 0.0  ;;  %v657_v16 = vmax.f32 %v607_v50, 0.0 }
  0xb8   : > { %v700_v24 = vpack.c.bf16 %v651_v43, %v650_v34  ;;  %v701_v46 = vpack.c.bf16 %v653_v12, %v652_v61  ;;  %v608_v20 = vadd.f32 %v2615_v58, %v553_v4  ;;  %v609_v8 = vadd.f32 %v2617_v23, %v554_v7 }
  0xb9   : > { %v702_v32 = vpack.c.bf16 %v655_v57, %v654_v30  ;;  %v703_v55 = vpack.c.bf16 %v657_v16, %v656_v60  ;;  %v610_v33 = vadd.f32 %v2615_v58, %v555_v10  ;;  %v611_v41 = vadd.f32 %v2617_v23, %v556_v1  ;;  %v2938_v16 = vld [vmem:[#allocation18_spill] sm:$0xff] }
  0xba   : > { %725 = vst [vmem:[#allocation2] sm:$0xff] %v700_v24  ;;  %v658_v52 = vmax.f32 %v608_v20, 0.0  ;;  %v659_v37 = vmax.f32 %v609_v8, 0.0  ;;  %v612_v56 = vadd.f32 %v2615_v58, %v557_v3  ;;  %v613_v0 = vadd.f32 %v2617_v23, %v558_v5  ;;  %v2939_v20 = vld [vmem:[#allocation19_spill] sm:$0xff]  ;;  %v2940_v8 = vld [vmem:[#allocation20_spill] sm:$0xff] }
  0xbb   : > { %726 = vst [vmem:[#allocation2 + $0x8] sm:$0xff] %v701_v46  ;;  %v660_v2 = vmax.f32 %v610_v33, 0.0  ;;  %v661_v26 = vmax.f32 %v611_v41, 0.0  ;;  %v614_v4 = vadd.f32 %v2615_v58, %v559_v11  ;;  %v615_v7 = vadd.f32 %v2617_v23, %v560_v13  ;;  %v2941_v33 = vld [vmem:[#allocation21_spill] sm:$0xff] }
  0xbc   : > { %727 = vst [vmem:[#allocation2 + $0x10] sm:$0xff] %v702_v32  ;;  %v704_v9 = vpack.c.bf16 %v659_v37, %v658_v52  ;;  %v662_v35 = vmax.f32 %v612_v56, 0.0  ;;  %v663_v10 = vmax.f32 %v613_v0, 0.0  ;;  %v616_v1 = vadd.f32 %v2615_v58, %v561_v15  ;;  %v2942_v52 = vld [vmem:[#allocation22_spill] sm:$0xff] }
  0xbd   : > { %728 = vst [vmem:[#allocation2 + $0x18] sm:$0xff] %v703_v55  ;;  %v705_v63 = vpack.c.bf16 %v661_v26, %v660_v2  ;;  %v664_v42 = vmax.f32 %v614_v4, 0.0  ;;  %v665_v62 = vmax.f32 %v615_v7, 0.0  ;;  %v617_v3 = vadd.f32 %v2617_v23, %v562_v40  ;;  %v2943_v2 = vld [vmem:[#allocation23_spill] sm:$0xff] }
  0xbe   : > { %729 = vst [vmem:[#allocation2 + $0x20] sm:$0xff] %v704_v9  ;;  %v706_v5 = vpack.c.bf16 %v663_v10, %v662_v35  ;;  %v666_v45 = vmax.f32 %v616_v1, 0.0  ;;  %v618_v49 = vadd.f32 %v2615_v58, %v563_v17  ;;  %v619_v11 = vadd.f32 %v2617_v23, %v564_v19 }
  0xbf   : > { %730 = vst [vmem:[#allocation2 + $0x28] sm:$0xff] %v705_v63  ;;  %v707_v13 = vpack.c.bf16 %v665_v62, %v664_v42  ;;  %v667_v14 = vmax.f32 %v617_v3, 0.0  ;;  %v620_v53 = vadd.f32 %v2615_v58, %v565_v21  ;;  %v621_v15 = vadd.f32 %v2617_v23, %v566_v25  ;;  %v2944_v42 = vld [vmem:[#allocation24_spill] sm:$0xff] }
  0xc0   : > { %731 = vst [vmem:[#allocation2 + $0x30] sm:$0xff] %v706_v5  ;;  %v668_v22 = vmax.f32 %v618_v49, 0.0  ;;  %v669_v50 = vmax.f32 %v619_v11, 0.0  ;;  %v622_v34 = vadd.f32 %v2615_v58, %v567_v27  ;;  %v623_v40 = vadd.f32 %v2617_v23, %v568_v29 }
  0xc1   : > { %732 = vst [vmem:[#allocation2 + $0x38] sm:$0xff] %v707_v13  ;;  %v708_v43 = vpack.c.bf16 %v667_v14, %v666_v45  ;;  %v670_v61 = vmax.f32 %v620_v53, 0.0  ;;  %v671_v17 = vmax.f32 %v621_v15, 0.0  ;;  %v624_v19 = vadd.f32 %v2615_v58, %v2627_v31 }
  0xc2   : > { %v709_v12 = vpack.c.bf16 %v669_v50, %v668_v22  ;;  %v672_v30 = vmax.f32 %v622_v34, 0.0  ;;  %v673_v57 = vmax.f32 %v623_v40, 0.0  ;;  %v625_v21 = vadd.f32 %v2617_v23, %v2631_v39 }
  0xc3   : > { %733 = vst [vmem:[#allocation2 + $0x40] sm:$0xff] %v708_v43  ;;  %v710_v25 = vpack.c.bf16 %v671_v17, %v670_v61  ;;  %v674_v60 = vmax.f32 %v624_v19, 0.0  ;;  %v572_v27 = vmul.f32 %v2571_v38, %v2938_v16  ;;  %v626_v29 = vadd.f32 %v2615_v58, %v2635_v47 }
  0xc4   : > { %734 = vst [vmem:[#allocation2 + $0x48] sm:$0xff] %v709_v12  ;;  %v711_v24 = vpack.c.bf16 %v673_v57, %v672_v30  ;;  %v675_v46 = vmax.f32 %v625_v21, 0.0  ;;  %v573_v31 = vmul.f32 %v2569_v54, %v2939_v20  ;;  %v574_v32 = vmul.f32 %v2571_v38, %v2940_v8  ;;  %v2946_v20 = vld [vmem:[#allocation26_spill] sm:$0xff] }
  0xc5   : > { %735 = vst [vmem:[#allocation2 + $0x50] sm:$0xff] %v710_v25  ;;  %v627_v39 = vadd.f32 %v2617_v23, %v572_v27  ;;  %v676_v55 = vmax.f32 %v626_v29, 0.0  ;;  %v575_v41 = vmul.f32 %v2569_v54, %v2941_v33  ;;  %v576_v37 = vmul.f32 %v2571_v38, %v2942_v52  ;;  %v2945_v25 = vld [vmem:[#allocation25_spill] sm:$0xff]  ;;  %v2948_v33 = vld [vmem:[#allocation28_spill] sm:$0xff] }
  0xc6   : > { %736 = vst [vmem:[#allocation2 + $0x58] sm:$0xff] %v711_v24  ;;  %v712_v47 = vpack.c.bf16 %v675_v46, %v674_v60  ;;  %v628_v56 = vadd.f32 %v2615_v58, %v573_v31  ;;  %v629_v0 = vadd.f32 %v2617_v23, %v574_v32  ;;  %v577_v26 = vmul.f32 %v2569_v54, %v2943_v2 }
  0xc7   : > { %v677_v4 = vmax.f32 %v627_v39, 0.0  ;;  %v630_v7 = vadd.f32 %v2615_v58, %v575_v41  ;;  %v631_v9 = vadd.f32 %v2617_v23, %v576_v37  ;;  %v578_v35 = vmul.f32 %v2571_v38, %v2445_v48  ;;  %v2947_v39 = vld [vmem:[#allocation27_spill] sm:$0xff] }
  0xc8   : > { %737 = vst [vmem:[#allocation2 + $0x60] sm:$0xff] %v712_v47  ;;  %v678_v10 = vmax.f32 %v628_v56, 0.0  ;;  %v679_v1 = vmax.f32 %v629_v0, 0.0  ;;  %v632_v63 = vadd.f32 %v2615_v58, %v577_v26  ;;  %v579_v62 = vmul.f32 %v2569_v54, %v2944_v42  ;;  %v2949_v47 = vld [vmem:[#allocation30_spill] sm:$0xff]  ;;  %v2950_v0 = vld [vmem:[#allocation32_spill] sm:$0xff]  ;;  %v2952_v42 = vld [vmem:[#allocation31_spill] sm:$0xff] }
  0xc9   : > { %v713_v3 = vpack.c.bf16 %v677_v4, %v676_v55  ;;  %v680_v5 = vmax.f32 %v630_v7, 0.0  ;;  %v681_v45 = vmax.f32 %v631_v9, 0.0  ;;  %v633_v49 = vadd.f32 %v2617_v23, %v578_v35  ;;  %v2951_v9 = vld [vmem:[#allocation29_spill] sm:$0xff] }
  0xca   : > { %v714_v11 = vpack.c.bf16 %v679_v1, %v678_v10  ;;  %v682_v13 = vmax.f32 %v632_v63, 0.0  ;;  %v580_v14 = vmul.f32 %v2571_v38, %v2455_v59  ;;  %v634_v48 = vadd.f32 %v2615_v58, %v579_v62 }
  0xcb   : > { %738 = vst [vmem:[#allocation2 + $0x68] sm:$0xff] %v713_v3  ;;  %v715_v53 = vpack.c.bf16 %v681_v45, %v680_v5  ;;  %v683_v15 = vmax.f32 %v633_v49, 0.0  ;;  %v581_v22 = vmul.f32 %v2569_v54, %v2460_v6  ;;  %v582_v50 = vmul.f32 %v2571_v38, %v2465_v18 }
  0xcc   : > { %739 = vst [vmem:[#allocation2 + $0x70] sm:$0xff] %v714_v11  ;;  %v635_v34 = vadd.f32 %v2617_v23, %v580_v14  ;;  %v684_v40 = vmax.f32 %v634_v48, 0.0  ;;  %v583_v43 = vmul.f32 %v2569_v54, %v2470_v28  ;;  %v584_v59 = vmul.f32 %v2571_v38, %v2475_v36 }
  0xcd   : > { %740 = vst [vmem:[#allocation2 + $0x78] sm:$0xff] %v715_v53  ;;  %v716_v61 = vpack.c.bf16 %v683_v15, %v682_v13  ;;  %v636_v17 = vadd.f32 %v2615_v58, %v581_v22  ;;  %v637_v19 = vadd.f32 %v2617_v23, %v582_v50  ;;  %v585_v6 = vmul.f32 %v2569_v54, %v2480_v44 }
  0xce   : > { %v685_v18 = vmax.f32 %v635_v34, 0.0  ;;  %v638_v12 = vadd.f32 %v2615_v58, %v583_v43  ;;  %v639_v30 = vadd.f32 %v2617_v23, %v584_v59  ;;  %v586_v28 = vmul.f32 %v2571_v38, %v2485_v51 }
  0xcf   : > { %741 = vst [vmem:[#allocation2 + $0x80] sm:$0xff] %v716_v61  ;;  %v686_v57 = vmax.f32 %v636_v17, 0.0  ;;  %v687_v36 = vmax.f32 %v637_v19, 0.0  ;;  %v640_v21 = vadd.f32 %v2615_v58, %v585_v6  ;;  %v587_v60 = vmul.f32 %v2569_v54, %v2945_v25 }
  0xd0   : > { %v717_v16 = vpack.c.bf16 %v685_v18, %v684_v40  ;;  %v688_v27 = vmax.f32 %v638_v12, 0.0  ;;  %v689_v29 = vmax.f32 %v639_v30, 0.0  ;;  %v641_v44 = vadd.f32 %v2617_v23, %v586_v28 }
  0xd1   : > { %v718_v24 = vpack.c.bf16 %v687_v36, %v686_v57  ;;  %v690_v46 = vmax.f32 %v640_v21, 0.0  ;;  %v588_v31 = vmul.f32 %v2571_v38, %v2946_v20  ;;  %v642_v51 = vadd.f32 %v2615_v58, %v587_v60 }
  0xd2   : > { %742 = vst [vmem:[#allocation2 + $0x88] sm:$0xff] %v717_v16  ;;  %v719_v8 = vpack.c.bf16 %v689_v29, %v688_v27  ;;  %v691_v32 = vmax.f32 %v641_v44, 0.0  ;;  %v589_v55 = vmul.f32 %v2569_v54, %v2947_v39  ;;  %v590_v41 = vmul.f32 %v2571_v38, %v2948_v33 }
  0xd3   : > { %743 = vst [vmem:[#allocation2 + $0x90] sm:$0xff] %v718_v24  ;;  %v643_v52 = vadd.f32 %v2617_v23, %v588_v31  ;;  %v692_v37 = vmax.f32 %v642_v51, 0.0  ;;  %v591_v56 = vmul.f32 %v2569_v54, %v2949_v47  ;;  %v592_v2 = vmul.f32 %v2571_v38, %v2950_v0 }
  0xd4   : > { %744 = vst [vmem:[#allocation2 + $0x98] sm:$0xff] %v719_v8  ;;  %v720_v26 = vpack.c.bf16 %v691_v32, %v690_v46  ;;  %v644_v4 = vadd.f32 %v2615_v58, %v589_v55  ;;  %v645_v7 = vadd.f32 %v2617_v23, %v590_v41  ;;  %v593_v35 = vmul.f32 %v2569_v54, %v2951_v9 }
  0xd5   : > { %v693_v10 = vmax.f32 %v643_v52, 0.0  ;;  %v646_v1 = vadd.f32 %v2615_v58, %v591_v56  ;;  %v647_v63 = vadd.f32 %v2617_v23, %v592_v2  ;;  %v594_v62 = vmul.f32 %v2571_v38, %v2952_v42 }
  0xd6   : > { %745 = vst [vmem:[#allocation2 + $0xa0] sm:$0xff] %v720_v26  ;;  %v694_v3 = vmax.f32 %v644_v4, 0.0  ;;  %v695_v5 = vmax.f32 %v645_v7, 0.0  ;;  %v648_v45 = vadd.f32 %v2615_v58, %v593_v35 }
  0xd7   : > { %v721_v49 = vpack.c.bf16 %v693_v10, %v692_v37  ;;  %v696_v11 = vmax.f32 %v646_v1, 0.0  ;;  %v697_v13 = vmax.f32 %v647_v63, 0.0  ;;  %v649_v14 = vadd.f32 %v2617_v23, %v594_v62 }
  0xd8   : > { %v722_v48 = vpack.c.bf16 %v695_v5, %v694_v3  ;;  %v698_v54 = vmax.f32 %v648_v45, 0.0 }
  0xd9   : > { %746 = vst [vmem:[#allocation2 + $0xa8] sm:$0xff] %v721_v49  ;;  %v723_v53 = vpack.c.bf16 %v697_v13, %v696_v11  ;;  %v699_v15 = vmax.f32 %v649_v14, 0.0 }
  0xda   : > { %747 = vst [vmem:[#allocation2 + $0xb0] sm:$0xff] %v722_v48 }
  0xdb   : > { %748 = vst [vmem:[#allocation2 + $0xb8] sm:$0xff] %v723_v53  ;;  %v724_v22 = vpack.c.bf16 %v699_v15, %v698_v54 }
  0xdd   : > { %749 = vst [vmem:[#allocation2 + $0xc0] sm:$0x33] %v724_v22 }
  0xde PF: > { %v1725_v38 = vld [vmem:[%s2304_s13 + $0x70] sm:$0xf]  ;;  %v1839_v58 = vld [vmem:[%s2304_s13 + $0x74] sm:$0xf0]  ;;  %v1838_v40 = vld [vmem:[%s2304_s13 + $0x74] sm:$0xf] }
  0xdf   : > { %v1789_v23 = vld [vmem:[%s2304_s13 + $0xf0] sm:$0xf]  ;;  %v1726_v50 = vor.u32 %v1839_v58, %v1725_v38  ;;  %v1855_v34 = vld [vmem:[%s2304_s13 + $0xf4] sm:$0xf0]  ;;  %v1727_v43 = vld [vmem:[%s2304_s13 + $0x78] sm:$0xf0] }
  0xe0   : > { %v1790_v59 = vor.u32 %v1855_v34, %v1789_v23  ;;  %v1730_v61 = vor.u32 %v1838_v40, %v1727_v43  ;;  %v1854_v17 = vld [vmem:[%s2304_s13 + $0xf4] sm:$0xf]  ;;  %v1791_v19 = vld [vmem:[%s2304_s13 + $0xf8] sm:$0xf0]  ;;  %v1717_v6 = vld [vmem:[%s2304_s13 + $0x60] sm:$0xf] }
  0xe1   : > { %1094 = vmatpush.bf16.msra.mxu0 %v1726_v50  ;;  %v1794_v18 = vor.u32 %v1854_v17, %v1791_v19  ;;  %v1837_v12 = vld [vmem:[%s2304_s13 + $0x64] sm:$0xf0]  ;;  %v1781_v30 = vld [vmem:[%s2304_s13 + $0xe0] sm:$0xf]  ;;  %v1836_v21 = vld [vmem:[%s2304_s13 + $0x64] sm:$0xf] }
  0xe2   : > { %v1853_v28 = vld [vmem:[%s2304_s13 + $0xe4] sm:$0xf0]  ;;  %1167 = vmatpush.bf16.msra.mxu1 %v1790_v59  ;;  %1240 = vmatpush.bf16.msra.mxu2 %v1730_v61  ;;  %v1718_v57 = vor.u32 %v1837_v12, %v1717_v6  ;;  %v1719_v25 = vld [vmem:[%s2304_s13 + $0x68] sm:$0xf0]  ;;  %v1852_v60 = vld [vmem:[%s2304_s13 + $0xe4] sm:$0xf] }
  0xe3   : > { %v1782_v36 = vor.u32 %v1853_v28, %v1781_v30  ;;  %1313 = vmatpush.bf16.msra.mxu3 %v1794_v18  ;;  %v1722_v16 = vor.u32 %v1836_v21, %v1719_v25  ;;  %v1783_v27 = vld [vmem:[%s2304_s13 + $0xe8] sm:$0xf0]  ;;  %v1709_v29 = vld [vmem:[%s2304_s13 + $0x50] sm:$0xf]  ;;  %v1835_v44 = vld [vmem:[%s2304_s13 + $0x54] sm:$0xf0] }
  0xe4   : > { %v1786_v24 = vor.u32 %v1852_v60, %v1783_v27  ;;  %v1773_v46 = vld [vmem:[%s2304_s13 + $0xd0] sm:$0xf]  ;;  %v1851_v20 = vld [vmem:[%s2304_s13 + $0xd4] sm:$0xf0]  ;;  %v1834_v31 = vld [vmem:[%s2304_s13 + $0x54] sm:$0xf]  ;;  %v1710_v51 = vor.u32 %v1835_v44, %v1709_v29 }
  0xe5   : > { %1095 = vmatpush.bf16.msra.mxu0 %v1718_v57  ;;  %v1711_v8 = vld [vmem:[%s2304_s13 + $0x58] sm:$0xf0]  ;;  %v1850_v32 = vld [vmem:[%s2304_s13 + $0xd4] sm:$0xf]  ;;  %v1774_v55 = vor.u32 %v1851_v20, %v1773_v46  ;;  %v1701_v41 = vld [vmem:[%s2304_s13 + $0x40] sm:$0xf] }
  0xe6   : > { %v1775_v39 = vld [vmem:[%s2304_s13 + $0xd8] sm:$0xf0]  ;;  %1168 = vmatpush.bf16.msra.mxu1 %v1782_v36  ;;  %1241 = vmatpush.bf16.msra.mxu2 %v1722_v16  ;;  %v1714_v33 = vor.u32 %v1834_v31, %v1711_v8  ;;  %v1833_v52 = vld [vmem:[%s2304_s13 + $0x44] sm:$0xf0]  ;;  %v1765_v37 = vld [vmem:[%s2304_s13 + $0xc0] sm:$0xf] }
  0xe7   : > { %1314 = vmatpush.bf16.msra.mxu3 %v1786_v24  ;;  %v1778_v47 = vor.u32 %v1850_v32, %v1775_v39  ;;  %v1849_v56 = vld [vmem:[%s2304_s13 + $0xc4] sm:$0xf0]  ;;  %v1832_v0 = vld [vmem:[%s2304_s13 + $0x44] sm:$0xf]  ;;  %v1703_v2 = vld [vmem:[%s2304_s13 + $0x48] sm:$0xf0]  ;;  %v1702_v7 = vor.u32 %v1833_v52, %v1701_v41 }
  0xe8   : > { %v1848_v26 = vld [vmem:[%s2304_s13 + $0xc4] sm:$0xf]  ;;  %v1767_v4 = vld [vmem:[%s2304_s13 + $0xc8] sm:$0xf0]  ;;  %v1766_v9 = vor.u32 %v1849_v56, %v1765_v37  ;;  %v1706_v35 = vor.u32 %v1832_v0, %v1703_v2  ;;  %v1693_v10 = vld [vmem:[%s2304_s13 + $0x30] sm:$0xf] }
  0xe9   : > { %1096 = vmatpush.bf16.msra.mxu0 %v1710_v51  ;;  %v1831_v1 = vld [vmem:[%s2304_s13 + $0x34] sm:$0xf0]  ;;  %v1757_v63 = vld [vmem:[%s2304_s13 + $0xb0] sm:$0xf]  ;;  %v1770_v42 = vor.u32 %v1848_v26, %v1767_v4  ;;  %v1830_v3 = vld [vmem:[%s2304_s13 + $0x34] sm:$0xf] }
  0xea   : > { %1169 = vmatpush.bf16.msra.mxu1 %v1774_v55  ;;  %1242 = vmatpush.bf16.msra.mxu2 %v1714_v33  ;;  %v1847_v62 = vld [vmem:[%s2304_s13 + $0xb4] sm:$0xf0]  ;;  %v1695_v5 = vld [vmem:[%s2304_s13 + $0x38] sm:$0xf0]  ;;  %v1846_v45 = vld [vmem:[%s2304_s13 + $0xb4] sm:$0xf]  ;;  %v1694_v11 = vor.u32 %v1831_v1, %v1693_v10 }
  0xeb   : > { %1315 = vmatpush.bf16.msra.mxu3 %v1778_v47  ;;  %v1759_v49 = vld [vmem:[%s2304_s13 + $0xb8] sm:$0xf0]  ;;  %v1758_v13 = vor.u32 %v1847_v62, %v1757_v63  ;;  %v1698_v14 = vor.u32 %v1830_v3, %v1695_v5  ;;  %v1685_v48 = vld [vmem:[%s2304_s13 + $0x20] sm:$0xf]  ;;  %v1829_v54 = vld [vmem:[%s2304_s13 + $0x24] sm:$0xf0] }
  0xec   : > { %v1749_v53 = vld [vmem:[%s2304_s13 + $0xa0] sm:$0xf]  ;;  %v1762_v15 = vor.u32 %v1846_v45, %v1759_v49  ;;  %v1845_v22 = vld [vmem:[%s2304_s13 + $0xa4] sm:$0xf0]  ;;  %v1828_v38 = vld [vmem:[%s2304_s13 + $0x24] sm:$0xf]  ;;  %v1686_v34 = vor.u32 %v1829_v54, %v1685_v48 }
  0xed   : > { %1097 = vmatpush.bf16.msra.mxu0 %v1702_v7  ;;  %v1687_v58 = vld [vmem:[%s2304_s13 + $0x28] sm:$0xf0]  ;;  %v1844_v23 = vld [vmem:[%s2304_s13 + $0xa4] sm:$0xf]  ;;  %v1750_v40 = vor.u32 %v1845_v22, %v1749_v53  ;;  %v1677_v59 = vld [vmem:[%s2304_s13 + $0x10] sm:$0xf] }
  0xee   : > { %1170 = vmatpush.bf16.msra.mxu1 %v1766_v9  ;;  %1243 = vmatpush.bf16.msra.mxu2 %v1706_v35  ;;  %v1751_v50 = vld [vmem:[%s2304_s13 + $0xa8] sm:$0xf0]  ;;  %v1690_v43 = vor.u32 %v1828_v38, %v1687_v58  ;;  %v1827_v61 = vld [vmem:[%s2304_s13 + $0x14] sm:$0xf0]  ;;  %v1741_v17 = vld [vmem:[%s2304_s13 + $0x90] sm:$0xf] }
  0xef   : > { %1316 = vmatpush.bf16.msra.mxu3 %v1770_v42  ;;  %v1754_v19 = vor.u32 %v1844_v23, %v1751_v50  ;;  %v1843_v6 = vld [vmem:[%s2304_s13 + $0x94] sm:$0xf0]  ;;  %v1826_v18 = vld [vmem:[%s2304_s13 + $0x14] sm:$0xf]  ;;  %v1679_v12 = vld [vmem:[%s2304_s13 + $0x18] sm:$0xf0]  ;;  %v1678_v57 = vor.u32 %v1827_v61, %v1677_v59 }
  0xf0   : > { %v1842_v30 = vld [vmem:[%s2304_s13 + $0x94] sm:$0xf]  ;;  %v1743_v28 = vld [vmem:[%s2304_s13 + $0x98] sm:$0xf0]  ;;  %v1742_v36 = vor.u32 %v1843_v6, %v1741_v17  ;;  %v1682_v21 = vor.u32 %v1826_v18, %v1679_v12  ;;  %v1669_v25 = vld [vmem:[%s2304_s13] sm:$0xf] }
  0xf1   : > { %1098 = vmatpush.bf16.msra.mxu0 %v1694_v11  ;;  %v1825_v60 = vld [vmem:[%s2304_s13 + $0x4] sm:$0xf0]  ;;  %v1733_v16 = vld [vmem:[%s2304_s13 + $0x80] sm:$0xf]  ;;  %v1746_v27 = vor.u32 %v1842_v30, %v1743_v28  ;;  %v1824_v44 = vld [vmem:[%s2304_s13 + $0x4] sm:$0xf] }
  0xf2   : > { %1171 = vmatpush.bf16.msra.mxu1 %v1758_v13  ;;  %1244 = vmatpush.bf16.msra.mxu2 %v1698_v14  ;;  %v1841_v29 = vld [vmem:[%s2304_s13 + $0x84] sm:$0xf0]  ;;  %v1671_v24 = vld [vmem:[%s2304_s13 + $0x8] sm:$0xf0]  ;;  %v1840_v46 = vld [vmem:[%s2304_s13 + $0x84] sm:$0xf]  ;;  %v1670_v31 = vor.u32 %v1825_v60, %v1669_v25 }
  0xf3   : > { %1317 = vmatpush.bf16.msra.mxu3 %v1762_v15  ;;  %v1735_v20 = vld [vmem:[%s2304_s13 + $0x88] sm:$0xf0]  ;;  %v1573_v51 = vld [vmem:[#allocation2] sm:$0xf]  ;;  %v1734_v32 = vor.u32 %v1841_v29, %v1733_v16  ;;  %v1674_v39 = vor.u32 %v1824_v44, %v1671_v24  ;;  %v1800_v55 = vld [vmem:[#allocation2 + $0x4] sm:$0xf] }
  0xf4   : > { %v1801_v8 = vld [vmem:[#allocation2 + $0x4] sm:$0xf0]  ;;  %v1575_v33 = vld [vmem:[#allocation2 + $0x8] sm:$0xf0]  ;;  %v1738_v41 = vor.u32 %v1840_v46, %v1735_v20  ;;  %v1581_v47 = vld [vmem:[#allocation2 + $0x10] sm:$0xf] }
  0xf5   : > { %1099 = vmatpush.bf16.msra.mxu0 %v1686_v34  ;;  %v1574_v52 = vor.u32 %v1801_v8, %v1573_v51  ;;  %v1578_v37 = vor.u32 %v1800_v55, %v1575_v33  ;;  %v1803_v56 = vld [vmem:[#allocation2 + $0x14] sm:$0xf0]  ;;  %v1802_v0 = vld [vmem:[#allocation2 + $0x14] sm:$0xf]  ;;  %v1583_v2 = vld [vmem:[#allocation2 + $0x18] sm:$0xf0] }
  0xf6   : > { %1172 = vmatpush.bf16.msra.mxu1 %v1750_v40  ;;  %1245 = vmatpush.bf16.msra.mxu2 %v1690_v43  ;;  %v1582_v26 = vor.u32 %v1803_v56, %v1581_v47  ;;  %v1586_v4 = vor.u32 %v1802_v0, %v1583_v2  ;;  %v1589_v7 = vld [vmem:[#allocation2 + $0x20] sm:$0xf]  ;;  %v1805_v9 = vld [vmem:[#allocation2 + $0x24] sm:$0xf0]  ;;  %v1804_v35 = vld [vmem:[#allocation2 + $0x24] sm:$0xf] }
  0xf7   : > { %1318 = vmatpush.bf16.msra.mxu3 %v1754_v19  ;;  %v1591_v10 = vld [vmem:[#allocation2 + $0x28] sm:$0xf0]  ;;  %v1590_v1 = vor.u32 %v1805_v9, %v1589_v7  ;;  %v1597_v42 = vld [vmem:[#allocation2 + $0x30] sm:$0xf]  ;;  %v1807_v62 = vld [vmem:[#allocation2 + $0x34] sm:$0xf0] }
  0xf8   : > { %v1594_v63 = vor.u32 %v1804_v35, %v1591_v10  ;;  %v1806_v3 = vld [vmem:[#allocation2 + $0x34] sm:$0xf]  ;;  %v1599_v5 = vld [vmem:[#allocation2 + $0x38] sm:$0xf0]  ;;  %v1598_v45 = vor.u32 %v1807_v62, %v1597_v42  ;;  %v1605_v11 = vld [vmem:[#allocation2 + $0x40] sm:$0xf] }
  0xf9   : > { %1100 = vmatpush.bf16.msra.mxu0 %v1678_v57  ;;  %v1602_v49 = vor.u32 %v1806_v3, %v1599_v5  ;;  %v1809_v13 = vld [vmem:[#allocation2 + $0x44] sm:$0xf0]  ;;  %v1808_v14 = vld [vmem:[#allocation2 + $0x44] sm:$0xf]  ;;  %v1607_v48 = vld [vmem:[#allocation2 + $0x48] sm:$0xf0] }
  0xfa   : > { %1173 = vmatpush.bf16.msra.mxu1 %v1742_v36  ;;  %1246 = vmatpush.bf16.msra.mxu2 %v1682_v21  ;;  %v1606_v54 = vor.u32 %v1809_v13, %v1605_v11  ;;  %v1610_v53 = vor.u32 %v1808_v14, %v1607_v48  ;;  %v1613_v15 = vld [vmem:[#allocation2 + $0x50] sm:$0xf]  ;;  %v1811_v22 = vld [vmem:[#allocation2 + $0x54] sm:$0xf0]  ;;  %v1810_v38 = vld [vmem:[#allocation2 + $0x54] sm:$0xf] }
  0xfb   : > { %1319 = vmatpush.bf16.msra.mxu3 %v1746_v27  ;;  %v1615_v58 = vld [vmem:[#allocation2 + $0x58] sm:$0xf0]  ;;  %v1614_v23 = vor.u32 %v1811_v22, %v1613_v15  ;;  %v1621_v34 = vld [vmem:[#allocation2 + $0x60] sm:$0xf]  ;;  %v1813_v40 = vld [vmem:[#allocation2 + $0x64] sm:$0xf0] }
  0xfc   : > { %v1618_v50 = vor.u32 %v1810_v38, %v1615_v58  ;;  %v1812_v43 = vld [vmem:[#allocation2 + $0x64] sm:$0xf]  ;;  %v1623_v59 = vld [vmem:[#allocation2 + $0x68] sm:$0xf0]  ;;  %v1622_v61 = vor.u32 %v1813_v40, %v1621_v34  ;;  %v1629_v19 = vld [vmem:[#allocation2 + $0x70] sm:$0xf] }
  0xfd   : > { %1101 = vmatpush.bf16.msra.mxu0 %v1670_v31  ;;  %v1626_v17 = vor.u32 %v1812_v43, %v1623_v59  ;;  %v1815_v6 = vld [vmem:[#allocation2 + $0x74] sm:$0xf0]  ;;  %v1814_v18 = vld [vmem:[#allocation2 + $0x74] sm:$0xf]  ;;  %v1631_v12 = vld [vmem:[#allocation2 + $0x78] sm:$0xf0] }
  0xfe   : > { %1174 = vmatpush.bf16.msra.mxu1 %v1734_v32  ;;  %1247 = vmatpush.bf16.msra.mxu2 %v1674_v39  ;;  %v1630_v30 = vor.u32 %v1815_v6, %v1629_v19  ;;  %v1634_v28 = vor.u32 %v1814_v18, %v1631_v12  ;;  %v1637_v57 = vld [vmem:[#allocation2 + $0x80] sm:$0xf]  ;;  %v1817_v36 = vld [vmem:[#allocation2 + $0x84] sm:$0xf0]  ;;  %v1816_v21 = vld [vmem:[#allocation2 + $0x84] sm:$0xf] }
  0xff   : > { %1320 = vmatpush.bf16.msra.mxu3 %v1738_v41  ;;  %v1639_v25 = vld [vmem:[#allocation2 + $0x88] sm:$0xf0]  ;;  %v1638_v60 = vor.u32 %v1817_v36, %v1637_v57  ;;  %v1645_v32 = vld [vmem:[#allocation2 + $0x90] sm:$0xf]  ;;  %v1819_v39 = vld [vmem:[#allocation2 + $0x94] sm:$0xf0] }
 0x100   : > { %1102 = vmatmul.bf16.vlgmr.msra.gmra.mxu0 %v1574_v52  ;;  %v1642_v27 = vor.u32 %v1816_v21, %v1639_v25  ;;  %v1818_v55 = vld [vmem:[#allocation2 + $0x94] sm:$0xf]  ;;  %v1647_v33 = vld [vmem:[#allocation2 + $0x98] sm:$0xf0]  ;;  %v1821_v42 = vld [vmem:[#allocation2 + $0xa4] sm:$0xf0] }
 0x101   : > { %1175 = vmatmul.bf16.vlgmr.msra.gmra.mxu1 %v1578_v37  ;;  %1248 = vmatmul.bf16.vlgmr.msra.gmra.mxu2 %v1574_v52  ;;  %v1646_v52 = vor.u32 %v1819_v39, %v1645_v32  ;;  %v1650_v56 = vor.u32 %v1818_v55, %v1647_v33  ;;  %v1820_v62 = vld [vmem:[#allocation2 + $0xa4] sm:$0xf]  ;;  %v1655_v3 = vld [vmem:[#allocation2 + $0xa8] sm:$0xf0]  ;;  %v1823_v34 = vld [vmem:[#allocation2 + $0xb4] sm:$0xf0] }
 0x102   : > { %1321 = vmatmul.bf16.vlgmr.msra.gmra.mxu3 %v1578_v37  ;;  %v1658_v13 = vor.u32 %v1820_v62, %v1655_v3  ;;  %v1822_v40 = vld [vmem:[#allocation2 + $0xb4] sm:$0xf]  ;;  %v1663_v43 = vld [vmem:[#allocation2 + $0xb8] sm:$0xf0]  ;;  %v774_v21 = vld [vmem:[#allocation2 + $0xc0] sm:$0x33] }
 0x103   : > { %v1666_v6 = vor.u32 %v1822_v40, %v1663_v43  ;;  %s1856_s26 = sshll.u32 %s2200_s19, 4  ;;  %s1449_s20 = sshll.u32 %s2311_s14, 4  ;;  %s1450_s20 = int_to_ptr.vmem [resolvable:$true] %s1449_s20 }
 0x104   : > { %s1448_s12 = scalar_lea.hbm %s2887_s4, %s1856_s26  ;;  %s1437_s19 = scalar_lea.sflag [#allocation5], %s2300_s8 }
 0x105   : > { %s1451_s5 = sshll.u32 %s1448_s12, 4  ;;  %s2087_s10 = scalar_lea.hbm %s2887_s4, 1600  ;;  %s1452_s5 = int_to_ptr.hbm [resolvable:$true] %s1451_s5 }
 0x106   : > { %s2081_s9 = sshra.s32 %s1452_s5, 4  ;;  %s2082_s9 = int_to_ptr.hbm [resolvable:$true] %s2081_s9 }
 0x107   : > { %s2083_s30 = scalar_lea.hbm %s2082_s9, 400  ;;  %p2088_p7 = scmp.lt.s32.totalorder %s2082_s9, %s2887_s4 }
 0x108   : > { %p2084_p6 = scmp.ne.s32.totalorder %s2082_s9, %s2083_s30  ;;  %p2089_p5 = scmp.lt.s32.totalorder %s2087_s10, %s2083_s30 }
 0x10a   : > { %p2085_p13 = pnand %p2084_p6, %p2231_p11  ;;  %p2090_p8 = por %p2089_p5, %p2088_p7 }
 0x10c   : > { %p2086_p1 = pneg %p2085_p13 }
 0x10e   : > { %p2091_p9 = pnand %p2090_p8, %p2086_p1 }
 0x110   : > { %1107 = vmatmul.bf16.gmra.mxu0 %v1582_v26 }
 0x111   : > { %1180 = vmatmul.bf16.gmra.mxu1 %v1586_v4  ;;  %1253 = vmatmul.bf16.gmra.mxu2 %v1582_v26 }
 0x112   : > { %1326 = vmatmul.bf16.gmra.mxu3 %v1586_v4 }
 0x120   : > { %1112 = vmatmul.bf16.gmra.mxu0 %v1590_v1 }
 0x121   : > { %1185 = vmatmul.bf16.gmra.mxu1 %v1594_v63  ;;  %1258 = vmatmul.bf16.gmra.mxu2 %v1590_v1 }
 0x122   : > { %1331 = vmatmul.bf16.gmra.mxu3 %v1594_v63  ;;  %v1653_v63 = vld [vmem:[#allocation2 + $0xa0] sm:$0xf] }
 0x130   : > { %1117 = vmatmul.bf16.gmra.mxu0 %v1598_v45 }
 0x131   : > { %1190 = vmatmul.bf16.gmra.mxu1 %v1602_v49  ;;  %1263 = vmatmul.bf16.gmra.mxu2 %v1598_v45  ;;  %v1654_v45 = vor.u32 %v1821_v42, %v1653_v63 }
 0x132   : > { %1336 = vmatmul.bf16.gmra.mxu3 %v1602_v49 }
 0x140   : > { %1122 = vmatmul.bf16.gmra.mxu0 %v1606_v54 }
 0x141   : > { %1195 = vmatmul.bf16.gmra.mxu1 %v1610_v53  ;;  %1268 = vmatmul.bf16.gmra.mxu2 %v1606_v54 }
 0x142   : > { %1341 = vmatmul.bf16.gmra.mxu3 %v1610_v53 }
 0x150   : > { %1127 = vmatmul.bf16.gmra.mxu0 %v1614_v23 }
 0x151   : > { %1200 = vmatmul.bf16.gmra.mxu1 %v1618_v50  ;;  %1273 = vmatmul.bf16.gmra.mxu2 %v1614_v23 }
 0x152   : > { %1346 = vmatmul.bf16.gmra.mxu3 %v1618_v50  ;;  %v1661_v50 = vld [vmem:[#allocation2 + $0xb0] sm:$0xf] }
 0x160   : > { %1132 = vmatmul.bf16.gmra.mxu0 %v1622_v61 }
 0x161   : > { %1205 = vmatmul.bf16.gmra.mxu1 %v1626_v17  ;;  %1278 = vmatmul.bf16.gmra.mxu2 %v1622_v61  ;;  %v1662_v61 = vor.u32 %v1823_v34, %v1661_v50 }
 0x162   : > { %1351 = vmatmul.bf16.gmra.mxu3 %v1626_v17 }
 0x170   : > { %1137 = vmatmul.bf16.gmra.mxu0 %v1630_v30 }
 0x171   : > { %1210 = vmatmul.bf16.gmra.mxu1 %v1634_v28  ;;  %1283 = vmatmul.bf16.gmra.mxu2 %v1630_v30 }
 0x172   : > { %1356 = vmatmul.bf16.gmra.mxu3 %v1634_v28 }
 0x17d   : > { %v1103_v16 = vpop.f32.mrf.mxu0 }
 0x17e   : > { %v1176_v29 = vpop.f32.mrf.mxu1 }
 0x17f   : > { %v1177_v44 = vadd.f32 %v1176_v29, %v1103_v16  ;;  %v881_v29 = vunpack.c.h.b16 %v774_v21 }
 0x180   : > { %1142 = vmatmul.bf16.gmra.mxu0 %v1638_v60 }
 0x181   : > { %1386 = vst [vmem:[%s2311_s14] sm:$0xff] %v1177_v44  ;;  %1215 = vmatmul.bf16.gmra.mxu1 %v1642_v27  ;;  %1288 = vmatmul.bf16.gmra.mxu2 %v1638_v60 }
 0x182   : > { %1361 = vmatmul.bf16.gmra.mxu3 %v1642_v27  ;;  %v880_v27 = vunpack.c.l.b16 %v774_v21 }
 0x184   : > { %v1249_v24 = vpop.f32.mrf.mxu2 }
 0x185   : > { %v1322_v46 = vpop.f32.mrf.mxu3  ;;  %v1105_v20 = vpop.f32.mrf.mxu0 }
 0x186   : > { %v1323_v31 = vadd.f32 %v1322_v46, %v1249_v24  ;;  %v1178_v51 = vpop.f32.mrf.mxu1  ;;  %v906_v24 = vpack.c.b16 %v880_v27, %v880_v27 }
 0x187   : > { %v1179_v8 = vadd.f32 %v1178_v51, %v1105_v20 }
 0x188   : > { %1387 = vst [vmem:[%s2311_s14 + $0x8] sm:$0xff] %v1323_v31  ;;  %v907_v31 = vpack.c.b16 %v881_v29, %v881_v29 }
 0x189   : > { %1388 = vst [vmem:[%s2311_s14 + $0x10] sm:$0xff] %v1179_v8 }
 0x18c   : > { %v1251_v41 = vpop.f32.mrf.mxu2 }
 0x18d   : > { %v1324_v37 = vpop.f32.mrf.mxu3  ;;  %v1108_v47 = vpop.f32.mrf.mxu0 }
 0x18e   : > { %v1325_v0 = vadd.f32 %v1324_v37, %v1251_v41  ;;  %v1181_v2 = vpop.f32.mrf.mxu1 }
 0x18f   : > { %v1182_v26 = vadd.f32 %v1181_v2, %v1108_v47 }
 0x190   : > { %1389 = vst [vmem:[%s2311_s14 + $0x18] sm:$0xff] %v1325_v0  ;;  %1147 = vmatmul.bf16.gmra.mxu0 %v1646_v52 }
 0x191   : > { %1390 = vst [vmem:[%s2311_s14 + $0x20] sm:$0xff] %v1182_v26  ;;  %1220 = vmatmul.bf16.gmra.mxu1 %v1650_v56  ;;  %1293 = vmatmul.bf16.gmra.mxu2 %v1646_v52 }
 0x192   : > { %1366 = vmatmul.bf16.gmra.mxu3 %v1650_v56 }
 0x194   : > { %v1254_v4 = vpop.f32.mrf.mxu2 }
 0x195   : > { %v1327_v7 = vpop.f32.mrf.mxu3  ;;  %v1110_v9 = vpop.f32.mrf.mxu0 }
 0x196   : > { %v1328_v35 = vadd.f32 %v1327_v7, %v1254_v4  ;;  %v1183_v10 = vpop.f32.mrf.mxu1 }
 0x197   : > { %v1184_v1 = vadd.f32 %v1183_v10, %v1110_v9 }
 0x198   : > { %1391 = vst [vmem:[%s2311_s14 + $0x28] sm:$0xff] %v1328_v35 }
 0x199   : > { %1392 = vst [vmem:[%s2311_s14 + $0x30] sm:$0xff] %v1184_v1 }
 0x19c   : > { %v1256_v5 = vpop.f32.mrf.mxu2 }
 0x19d   : > { %v1329_v49 = vpop.f32.mrf.mxu3  ;;  %v1113_v11 = vpop.f32.mrf.mxu0 }
 0x19e   : > { %v1330_v14 = vadd.f32 %v1329_v49, %v1256_v5  ;;  %v1186_v48 = vpop.f32.mrf.mxu1 }
 0x19f   : > { %v1187_v54 = vadd.f32 %v1186_v48, %v1113_v11 }
 0x1a0   : > { %1393 = vst [vmem:[%s2311_s14 + $0x38] sm:$0xff] %v1330_v14  ;;  %1152 = vmatmul.bf16.gmra.mxu0 %v1654_v45 }
 0x1a1   : > { %1394 = vst [vmem:[%s2311_s14 + $0x40] sm:$0xff] %v1187_v54  ;;  %1225 = vmatmul.bf16.gmra.mxu1 %v1658_v13  ;;  %1298 = vmatmul.bf16.gmra.mxu2 %v1654_v45 }
 0x1a2   : > { %1371 = vmatmul.bf16.gmra.mxu3 %v1658_v13 }
 0x1a4   : > { %v1259_v53 = vpop.f32.mrf.mxu2 }
 0x1a5   : > { %v1332_v15 = vpop.f32.mrf.mxu3  ;;  %v1115_v22 = vpop.f32.mrf.mxu0 }
 0x1a6   : > { %v1333_v38 = vadd.f32 %v1332_v15, %v1259_v53  ;;  %v1188_v58 = vpop.f32.mrf.mxu1 }
 0x1a7   : > { %v1189_v23 = vadd.f32 %v1188_v58, %v1115_v22 }
 0x1a8   : > { %1395 = vst [vmem:[%s2311_s14 + $0x48] sm:$0xff] %v1333_v38 }
 0x1a9   : > { %1396 = vst [vmem:[%s2311_s14 + $0x50] sm:$0xff] %v1189_v23 }
 0x1ac   : > { %v1261_v59 = vpop.f32.mrf.mxu2 }
 0x1ad   : > { %v1334_v17 = vpop.f32.mrf.mxu3  ;;  %v1118_v19 = vpop.f32.mrf.mxu0 }
 0x1ae   : > { %v1335_v18 = vadd.f32 %v1334_v17, %v1261_v59  ;;  %v1191_v12 = vpop.f32.mrf.mxu1 }
 0x1af   : > { %v1192_v30 = vadd.f32 %v1191_v12, %v1118_v19 }
 0x1b0   : > { %1397 = vst [vmem:[%s2311_s14 + $0x58] sm:$0xff] %v1335_v18  ;;  %1157 = vmatmul.bf16.gmra.mxu0 %v1662_v61 }
 0x1b1   : > { %1398 = vst [vmem:[%s2311_s14 + $0x60] sm:$0xff] %v1192_v30  ;;  %1230 = vmatmul.bf16.gmra.mxu1 %v1666_v6  ;;  %1303 = vmatmul.bf16.gmra.mxu2 %v1662_v61 }
 0x1b2   : > { %1376 = vmatmul.bf16.gmra.mxu3 %v1666_v6 }
 0x1b4   : > { %v1264_v28 = vpop.f32.mrf.mxu2 }
 0x1b5   : > { %v1337_v57 = vpop.f32.mrf.mxu3  ;;  %v1120_v36 = vpop.f32.mrf.mxu0 }
 0x1b6   : > { %v1338_v25 = vadd.f32 %v1337_v57, %v1264_v28  ;;  %v1193_v60 = vpop.f32.mrf.mxu1 }
 0x1b7   : > { %v1194_v16 = vadd.f32 %v1193_v60, %v1120_v36 }
 0x1b8   : > { %1399 = vst [vmem:[%s2311_s14 + $0x68] sm:$0xff] %v1338_v25 }
 0x1b9   : > { %1400 = vst [vmem:[%s2311_s14 + $0x70] sm:$0xff] %v1194_v16 }
 0x1bc   : > { %v1266_v44 = vpop.f32.mrf.mxu2 }
 0x1bd   : > { %v1339_v46 = vpop.f32.mrf.mxu3  ;;  %v1123_v20 = vpop.f32.mrf.mxu0 }
 0x1be   : > { %v1340_v51 = vadd.f32 %v1339_v46, %v1266_v44  ;;  %v1196_v8 = vpop.f32.mrf.mxu1 }
 0x1bf   : > { %v1197_v32 = vadd.f32 %v1196_v8, %v1123_v20 }
 0x1c0   : > { %1401 = vst [vmem:[%s2311_s14 + $0x78] sm:$0xff] %v1340_v51  ;;  %1162 = vmatmul.bf16.gmra.mxu0 %v906_v24 }
 0x1c1   : > { %1402 = vst [vmem:[%s2311_s14 + $0x80] sm:$0xff] %v1197_v32  ;;  %1235 = vmatmul.bf16.gmra.mxu1 %v907_v31  ;;  %1308 = vmatmul.bf16.gmra.mxu2 %v906_v24 }
 0x1c2   : > { %1381 = vmatmul.bf16.gmra.mxu3 %v907_v31 }
 0x1c4   : > { %v1269_v39 = vpop.f32.mrf.mxu2 }
 0x1c5   : > { %v1342_v55 = vpop.f32.mrf.mxu3  ;;  %v1125_v33 = vpop.f32.mrf.mxu0 }
 0x1c6   : > { %v1343_v41 = vadd.f32 %v1342_v55, %v1269_v39  ;;  %v1198_v52 = vpop.f32.mrf.mxu1 }
 0x1c7   : > { %v1199_v37 = vadd.f32 %v1198_v52, %v1125_v33 }
 0x1c8   : > { %1403 = vst [vmem:[%s2311_s14 + $0x88] sm:$0xff] %v1343_v41 }
 0x1c9   : > { %1404 = vst [vmem:[%s2311_s14 + $0x90] sm:$0xff] %v1199_v37 }
 0x1cc   : > { %v1271_v47 = vpop.f32.mrf.mxu2 }
 0x1cd   : > { %v1344_v56 = vpop.f32.mrf.mxu3  ;;  %v1128_v0 = vpop.f32.mrf.mxu0 }
 0x1ce   : > { %v1345_v2 = vadd.f32 %v1344_v56, %v1271_v47  ;;  %v1201_v26 = vpop.f32.mrf.mxu1 }
 0x1cf   : > { %v1202_v4 = vadd.f32 %v1201_v26, %v1128_v0 }
 0x1d0   : > { %1405 = vst [vmem:[%s2311_s14 + $0x98] sm:$0xff] %v1345_v2 }
 0x1d1   : > { %1406 = vst [vmem:[%s2311_s14 + $0xa0] sm:$0xff] %v1202_v4 }
 0x1d4   : > { %v1274_v7 = vpop.f32.mrf.mxu2 }
 0x1d5   : > { %v1347_v9 = vpop.f32.mrf.mxu3  ;;  %v1130_v35 = vpop.f32.mrf.mxu0 }
 0x1d6   : > { %v1348_v10 = vadd.f32 %v1347_v9, %v1274_v7  ;;  %v1203_v1 = vpop.f32.mrf.mxu1 }
 0x1d7   : > { %v1204_v63 = vadd.f32 %v1203_v1, %v1130_v35 }
 0x1d8   : > { %1407 = vst [vmem:[%s2311_s14 + $0xa8] sm:$0xff] %v1348_v10 }
 0x1d9   : > { %1408 = vst [vmem:[%s2311_s14 + $0xb0] sm:$0xff] %v1204_v63 }
 0x1dc   : > { %v1276_v42 = vpop.f32.mrf.mxu2 }
 0x1dd   : > { %v1349_v62 = vpop.f32.mrf.mxu3  ;;  %v1133_v3 = vpop.f32.mrf.mxu0 }
 0x1de   : > { %v1350_v5 = vadd.f32 %v1349_v62, %v1276_v42  ;;  %v1206_v45 = vpop.f32.mrf.mxu1 }
 0x1df   : > { %v1207_v49 = vadd.f32 %v1206_v45, %v1133_v3 }
 0x1e0   : > { %1409 = vst [vmem:[%s2311_s14 + $0xb8] sm:$0xff] %v1350_v5 }
 0x1e1   : > { %1410 = vst [vmem:[%s2311_s14 + $0xc0] sm:$0xff] %v1207_v49 }
 0x1e4   : > { %v1279_v11 = vpop.f32.mrf.mxu2 }
 0x1e5   : > { %v1352_v13 = vpop.f32.mrf.mxu3  ;;  %v1135_v14 = vpop.f32.mrf.mxu0 }
 0x1e6   : > { %v1353_v48 = vadd.f32 %v1352_v13, %v1279_v11  ;;  %v1208_v54 = vpop.f32.mrf.mxu1 }
 0x1e7   : > { %v1209_v53 = vadd.f32 %v1208_v54, %v1135_v14 }
 0x1e8   : > { %1411 = vst [vmem:[%s2311_s14 + $0xc8] sm:$0xff] %v1353_v48 }
 0x1e9   : > { %1412 = vst [vmem:[%s2311_s14 + $0xd0] sm:$0xff] %v1209_v53 }
 0x1ec   : > { %v1281_v15 = vpop.f32.mrf.mxu2 }
 0x1ed   : > { %v1354_v22 = vpop.f32.mrf.mxu3  ;;  %v1138_v38 = vpop.f32.mrf.mxu0 }
 0x1ee   : > { %v1355_v58 = vadd.f32 %v1354_v22, %v1281_v15  ;;  %v1211_v23 = vpop.f32.mrf.mxu1 }
 0x1ef   : > { %v1212_v50 = vadd.f32 %v1211_v23, %v1138_v38 }
 0x1f0   : > { %1413 = vst [vmem:[%s2311_s14 + $0xd8] sm:$0xff] %v1355_v58 }
 0x1f1   : > { %1414 = vst [vmem:[%s2311_s14 + $0xe0] sm:$0xff] %v1212_v50 }
 0x1f4   : > { %v1284_v34 = vpop.f32.mrf.mxu2 }
 0x1f5   : > { %v1357_v40 = vpop.f32.mrf.mxu3  ;;  %v1140_v43 = vpop.f32.mrf.mxu0 }
 0x1f6   : > { %v1358_v59 = vadd.f32 %v1357_v40, %v1284_v34  ;;  %v1213_v61 = vpop.f32.mrf.mxu1 }
 0x1f7   : > { %v1214_v17 = vadd.f32 %v1213_v61, %v1140_v43 }
 0x1f8   : > { %1415 = vst [vmem:[%s2311_s14 + $0xe8] sm:$0xff] %v1358_v59 }
 0x1f9   : > { %1416 = vst [vmem:[%s2311_s14 + $0xf0] sm:$0xff] %v1214_v17 }
 0x1fc   : > { %v1286_v19 = vpop.f32.mrf.mxu2 }
 0x1fd   : > { %v1359_v6 = vpop.f32.mrf.mxu3  ;;  %v1143_v18 = vpop.f32.mrf.mxu0 }
 0x1fe   : > { %v1360_v12 = vadd.f32 %v1359_v6, %v1286_v19  ;;  %v1216_v30 = vpop.f32.mrf.mxu1 }
 0x1ff   : > { %v1217_v28 = vadd.f32 %v1216_v30, %v1143_v18 }
 0x200   : > { %1417 = vst [vmem:[%s2311_s14 + $0xf8] sm:$0xff] %v1360_v12 }
 0x201   : > { %1418 = vst [vmem:[%s2311_s14 + $0x100] sm:$0xff] %v1217_v28 }
 0x204   : > { %v1289_v57 = vpop.f32.mrf.mxu2 }
 0x205   : > { %v1362_v36 = vpop.f32.mrf.mxu3  ;;  %v1145_v21 = vpop.f32.mrf.mxu0 }
 0x206   : > { %v1363_v25 = vadd.f32 %v1362_v36, %v1289_v57  ;;  %v1218_v60 = vpop.f32.mrf.mxu1 }
 0x207   : > { %v1219_v16 = vadd.f32 %v1218_v60, %v1145_v21 }
 0x208   : > { %1419 = vst [vmem:[%s2311_s14 + $0x108] sm:$0xff] %v1363_v25 }
 0x209   : > { %1420 = vst [vmem:[%s2311_s14 + $0x110] sm:$0xff] %v1219_v16 }
 0x20c   : > { %v1291_v27 = vpop.f32.mrf.mxu2 }
 0x20d   : > { %v1364_v29 = vpop.f32.mrf.mxu3  ;;  %v1148_v44 = vpop.f32.mrf.mxu0 }
 0x20e   : > { %v1365_v24 = vadd.f32 %v1364_v29, %v1291_v27  ;;  %v1221_v46 = vpop.f32.mrf.mxu1 }
 0x20f   : > { %v1222_v20 = vadd.f32 %v1221_v46, %v1148_v44 }
 0x210   : > { %1421 = vst [vmem:[%s2311_s14 + $0x118] sm:$0xff] %v1365_v24 }
 0x211   : > { %1422 = vst [vmem:[%s2311_s14 + $0x120] sm:$0xff] %v1222_v20 }
 0x214   : > { %v1294_v31 = vpop.f32.mrf.mxu2 }
 0x215   : > { %v1367_v51 = vpop.f32.mrf.mxu3  ;;  %v1150_v8 = vpop.f32.mrf.mxu0 }
 0x216   : > { %v1368_v32 = vadd.f32 %v1367_v51, %v1294_v31  ;;  %v1223_v39 = vpop.f32.mrf.mxu1 }
 0x217   : > { %v1224_v55 = vadd.f32 %v1223_v39, %v1150_v8 }
 0x218   : > { %1423 = vst [vmem:[%s2311_s14 + $0x128] sm:$0xff] %v1368_v32 }
 0x219   : > { %1424 = vst [vmem:[%s2311_s14 + $0x130] sm:$0xff] %v1224_v55 }
 0x21c   : > { %v1296_v33 = vpop.f32.mrf.mxu2 }
 0x21d   : > { %v1369_v41 = vpop.f32.mrf.mxu3  ;;  %v1153_v52 = vpop.f32.mrf.mxu0 }
 0x21e   : > { %v1370_v37 = vadd.f32 %v1369_v41, %v1296_v33  ;;  %v1226_v47 = vpop.f32.mrf.mxu1 }
 0x21f   : > { %v1227_v56 = vadd.f32 %v1226_v47, %v1153_v52 }
 0x220   : > { %1425 = vst [vmem:[%s2311_s14 + $0x138] sm:$0xff] %v1370_v37 }
 0x221   : > { %1426 = vst [vmem:[%s2311_s14 + $0x140] sm:$0xff] %v1227_v56 }
 0x224   : > { %v1299_v0 = vpop.f32.mrf.mxu2 }
 0x225   : > { %v1372_v2 = vpop.f32.mrf.mxu3  ;;  %v1155_v26 = vpop.f32.mrf.mxu0 }
 0x226   : > { %v1373_v4 = vadd.f32 %v1372_v2, %v1299_v0  ;;  %v1228_v7 = vpop.f32.mrf.mxu1 }
 0x227   : > { %v1229_v9 = vadd.f32 %v1228_v7, %v1155_v26 }
 0x228   : > { %1427 = vst [vmem:[%s2311_s14 + $0x148] sm:$0xff] %v1373_v4 }
 0x229   : > { %1428 = vst [vmem:[%s2311_s14 + $0x150] sm:$0xff] %v1229_v9 }
 0x22c   : > { %v1301_v35 = vpop.f32.mrf.mxu2 }
 0x22d   : > { %v1374_v10 = vpop.f32.mrf.mxu3  ;;  %v1158_v1 = vpop.f32.mrf.mxu0 }
 0x22e   : > { %v1375_v63 = vadd.f32 %v1374_v10, %v1301_v35  ;;  %v1231_v42 = vpop.f32.mrf.mxu1 }
 0x22f   : > { %v1232_v62 = vadd.f32 %v1231_v42, %v1158_v1 }
 0x230   : > { %1429 = vst [vmem:[%s2311_s14 + $0x158] sm:$0xff] %v1375_v63 }
 0x231   : > { %1430 = vst [vmem:[%s2311_s14 + $0x160] sm:$0xff] %v1232_v62 }
 0x234   : > { %v1304_v3 = vpop.f32.mrf.mxu2 }
 0x235   : > { %v1377_v5 = vpop.f32.mrf.mxu3  ;;  %v1160_v45 = vpop.f32.mrf.mxu0 }
 0x236   : > { %v1378_v49 = vadd.f32 %v1377_v5, %v1304_v3  ;;  %v1233_v11 = vpop.f32.mrf.mxu1 }
 0x237   : > { %v1234_v13 = vadd.f32 %v1233_v11, %v1160_v45 }
 0x238   : > { %1431 = vst [vmem:[%s2311_s14 + $0x168] sm:$0xff] %v1378_v49 }
 0x239   : > { %1432 = vst [vmem:[%s2311_s14 + $0x170] sm:$0xff] %v1234_v13 }
 0x23c   : > { %v1306_v14 = vpop.f32.mrf.mxu2 }
 0x23d   : > { %v1379_v48 = vpop.f32.mrf.mxu3  ;;  %v1163_v54 = vpop.f32.mrf.mxu0 }
 0x23e   : > { %v1380_v53 = vadd.f32 %v1379_v48, %v1306_v14  ;;  %v1236_v15 = vpop.f32.mrf.mxu1 }
 0x23f   : > { %v1237_v22 = vadd.f32 %v1236_v15, %v1163_v54 }
 0x240   : > { %1433 = vst [vmem:[%s2311_s14 + $0x178] sm:$0xff] %v1380_v53 }
 0x241   : > { %1434 = vst [vmem:[%s2311_s14 + $0x180] sm:$0xf] %v1237_v22 }
 0x244   : > { %v1309_v38 = vpop.f32.mrf.mxu2 }
 0x245   : > { %v1382_v58 = vpop.f32.mrf.mxu3  ;;  %v1165_v23 = vpop.f32.mrf.mxu0 }
 0x246   : > { %v1383_v50 = vadd.f32 %v1382_v58, %v1309_v38  ;;  %v1238_v34 = vpop.f32.mrf.mxu1 }
 0x248   : > { %1435 = vst [vmem:[%s2311_s14 + $0x188] sm:$0xf] %v1383_v50 }
 0x249   : > { %2094 = shalt.err (!%p2091_p9)
}
 0x24a   : > { %s2151_s25 = smov 256   ;;  %s2152_s8 = smov 1024  }
 0x24b   : > { %s2153_s2 = smov 16  }
 0x24c   : > { %1872 = dma.vmem_to_hbm [thread:$0]  (%p2231_p11), %s1450_s20, 6400, %s1452_s5, %s1437_s19, %s2151_s25, %s2152_s8, %s2153_s2   ;;  %v1311_v40 = vpop.f32.mrf.mxu2 }
 0x24d   : > { %v1384_v43 = vpop.f32.mrf.mxu3 }
 0x24e PF: > { %p1899_p10 = scmp.ge.s32.totalorder %s2141_s18, 2  ;;  %s1466_s29 = sand.u32 1, %s2129_s15  }
 0x24f   : > { %s1467_s13 = scalar_lea.sflag [#allocation5], %s1466_s29 }
 0x250   : > { %p1889_p2 = pnand %p1899_p10, %p2235_p12 }
 0x252   : > { %p1890_p0 = pneg %p1889_p2 }
 0x254   : > { %2124 = dma.done.wait (%p1890_p0), %s1467_s13, 6400  }
 0x255   : > { %2126 = vsyncadd (%p1890_p0), %s1467_s13, 4294960896  ;;  %p19_p11 = scmp.ge.s32.totalorder %s2204_s21, 6   ;;  %s2953_s15 = smov %s2133_s16 }
 0x256   : > { %s2954_s16 = smov %s2137_s17  ;;  %s2955_s17 = smov %s2216_s24 }
 0x257   : > { %s2956_s18 = smov %s2204_s21  ;;  %21 = sbr.rel (!%p19_p11) target bundleno = 11 (0xb), region = 98 }
 0x25c   :  { %1473 = vsyncpa [#allocation4], 1 }
 0x25d   :  { %1475 = vsyncpa [#allocation4 + $0x1], 1 }
 0x25e   :  { %1476 = vsyncpa [#allocation7], 1 }
 0x25f   :  { %1477 = vsyncpa [#allocation10], 1 }
 0x260   :  { %1479 = vsyncpa [#allocation10 + $0x1], 1 }
 0x261   :  { %1480 = vsyncpa [#allocation5], 1 }
 0x262   :  { %1482 = vsyncpa [#allocation5 + $0x1], 1 }

</bundles_post_ra>
